<compile_context>
chip_gen: v6e
topology: v6e:2x2x1
jax: 0.10.0
libtpu: 0.0.40
codegen_flags: <defaults>
</compile_context>

<pallas_src>
import jax
import jax.numpy as jnp
from jax.experimental import pallas as pl
from jax.experimental.pallas import tpu as pltpu

TIME_EMBEDDING = 32


# ------------------------------ fused kernel ------------------------------- #

def _fused_kernel(x_ref, t_ref, w_ref, b_ref, o_ref, xpad_ref):
    """Entire SingleSignalDown forward for one batch element.

    x_ref:   (1, L, ID)      input signal, channels-last
    t_ref:   (1, L, TD)      time embedding, channels-last
    w_ref:   (30, Cmax, OD)  10 conv weight slabs x 3 taps, Cin zero-padded to Cmax
    b_ref:   (8, 1, OD)      biases of the 8 logical convs
    o_ref:   (1, L, 2*OD)    packed output: [..., :OD]=forward_1, [..., OD:]=forward_2
    xpad_ref:(L+2, Cmax) f32 zero-halo scratch reused by every conv layer
    """
    L = o_ref.shape[1]
    OD = b_ref.shape[2]

    # Kill stale VMEM garbage once; halo rows 0 and L+1 are never written again,
    # and columns beyond a layer's true Cin are nulled by the zero-padded weights.
    xpad_ref[...] = jnp.zeros_like(xpad_ref)

    def conv3(inputs, bidx, relu, skip=None):
        # inputs: list of (activation (L, Cin), weight-slab index). Contributions
        # of the split input-channel groups are summed, then bias / residual / ReLU.
        acc = None
        for x2d, widx in inputs:
            cin = x2d.shape[-1]
            xpad_ref[1:L + 1, :cin] = x2d.astype(xpad_ref.dtype)
            xp = xpad_ref[...]                       # (L+2, Cmax), halo rows are zero
            for s in range(3):                       # k=3 'same' = 3 shifted matmuls
                part = jnp.dot(xp[s:s + L, :], w_ref[3 * widx + s],
                               preferred_element_type=jnp.float32)
                acc = part if acc is None else acc + part
        acc = acc + b_ref[bidx]
        if skip is not None:
            acc = acc + skip
        if relu:
            acc = jnp.maximum(acc, 0.0)
        return acc

    x = x_ref[0].astype(jnp.float32)     # (L, ID)
    t = t_ref[0].astype(jnp.float32)     # (L, TD)

    f0 = conv3([(x, 0)], bidx=0, relu=True)               # Conv1S
    h1 = conv3([(f0, 1), (t, 2)], bidx=1, relu=True)      # ConvRes1 conv-a (concat split)
    f1 = conv3([(h1, 3)], bidx=2, relu=True, skip=f0)     # ConvRes1 conv-b + residual + ReLU
    f1 = conv3([(f1, 4)], bidx=3, relu=True)              # Conv1E

    f2 = conv3([(f1, 5)], bidx=4, relu=True)              # Conv2S
    h2 = conv3([(f2, 6), (t, 7)], bidx=5, relu=True)      # ConvRes2 conv-a (concat split)
    f2 = conv3([(h2, 8)], bidx=6, relu=True, skip=f2)     # ConvRes2 conv-b + residual + ReLU
    f2 = conv3([(f2, 9)], bidx=7, relu=True)              # Conv2E

    o_ref[0, :, 0:OD] = f1.astype(o_ref.dtype)
    o_ref[0, :, OD:2 * OD] = f2.astype(o_ref.dtype)


# ------------------------- parameter initialization ------------------------ #

def init_params(key, input_dim=16, output_dim=32):
    """Deterministic synthetic weights. Conv weights stored as (3, Cin, Cout)."""
    def conv_init(k, cin, cout):
        kw, kb = jax.random.split(k)
        scale = 1.0 / jnp.sqrt(cin * 3.0)
        w = jax.random.uniform(kw, (3, cin, cout), jnp.float32, -scale, scale)
        b = jax.random.uniform(kb, (1, cout), jnp.float32, -scale, scale)
        return w, b

    keys = jax.random.split(key, 8)
    od, td = output_dim, TIME_EMBEDDING
    return {
        "conv1s": conv_init(keys[0], input_dim, od),
        "conv1e": conv_init(keys[1], od, od),
        "conv2s": conv_init(keys[2], od, od),
        "conv2e": conv_init(keys[3], od, od),
        "res1a": conv_init(keys[4], od + td, od),
        "res1b": conv_init(keys[5], od, od),
        "res2a": conv_init(keys[6], od + td, od),
        "res2b": conv_init(keys[7], od, od),
    }


def _pack_params(params, input_dim, output_dim):
    """Pack all conv weights into one (30, Cmax, OD) slab stack + (8, 1, OD) biases."""
    OD, TD = output_dim, TIME_EMBEDDING
    Cmax = max(input_dim, OD, TD)

    def pad_cin(w):  # (3, cin, OD) -> (3, Cmax, OD), zero-pad the Cin axis
        return jnp.pad(w, ((0, 0), (0, Cmax - w.shape[1]), (0, 0)))

    w1s, b1s = params["conv1s"]
    wr1a, br1a = params["res1a"]
    wr1b, br1b = params["res1b"]
    w1e, b1e = params["conv1e"]
    w2s, b2s = params["conv2s"]
    wr2a, br2a = params["res2a"]
    wr2b, br2b = params["res2b"]
    w2e, b2e = params["conv2e"]

    slabs = [
        pad_cin(w1s),               # 0: Conv1S
        pad_cin(wr1a[:, :OD, :]),   # 1: ConvRes1 conv-a, activation half of the concat
        pad_cin(wr1a[:, OD:, :]),   # 2: ConvRes1 conv-a, time-embedding half
        pad_cin(wr1b),              # 3: ConvRes1 conv-b
        pad_cin(w1e),               # 4: Conv1E
        pad_cin(w2s),               # 5: Conv2S
        pad_cin(wr2a[:, :OD, :]),   # 6: ConvRes2 conv-a, activation half
        pad_cin(wr2a[:, OD:, :]),   # 7: ConvRes2 conv-a, time-embedding half
        pad_cin(wr2b),              # 8: ConvRes2 conv-b
        pad_cin(w2e),               # 9: Conv2E
    ]
    w_all = jnp.concatenate(slabs, axis=0)                                   # (30, Cmax, OD)
    b_all = jnp.stack([b1s, br1a, br1b, b1e, b2s, br2a, br2b, b2e], axis=0)  # (8, 1, OD)
    return w_all, b_all


# ------------------------------- forward pass ------------------------------ #

def single_signal_down_forward(params, time_embed_ncl, input_ncl):
    """Mirrors SingleSignalDown.forward. Inputs/outputs are NCL (PyTorch layout)."""
    B, ID, L = input_ncl.shape
    TD = time_embed_ncl.shape[1]
    OD = params["conv1s"][0].shape[2]

    w_all, b_all = _pack_params(params, ID, OD)
    Cmax = w_all.shape[1]

    x = jnp.transpose(input_ncl, (0, 2, 1))        # (B, L, ID)  channels-last
    t = jnp.transpose(time_embed_ncl, (0, 2, 1))   # (B, L, TD)

    out = pl.pallas_call(
        _fused_kernel,
        out_shape=jax.ShapeDtypeStruct((B, L, 2 * OD), x.dtype),
        grid=(B,),
        in_specs=[
            pl.BlockSpec((1, L, ID), lambda i: (i, 0, 0)),
            pl.BlockSpec((1, L, TD), lambda i: (i, 0, 0)),
            pl.BlockSpec((30, Cmax, OD), lambda i: (0, 0, 0)),   # weights: DMA'd once
            pl.BlockSpec((8, 1, OD), lambda i: (0, 0, 0)),       # biases:  DMA'd once
        ],
        out_specs=pl.BlockSpec((1, L, 2 * OD), lambda i: (i, 0, 0)),
        scratch_shapes=[pltpu.VMEM((L + 2, Cmax), jnp.float32)],
        compiler_params=pltpu.CompilerParams(dimension_semantics=("parallel",)),
    )(x, t, w_all, b_all)

    f1 = jnp.transpose(out[:, :, :OD], (0, 2, 1))   # (B, OD, L)
    f2 = jnp.transpose(out[:, :, OD:], (0, 2, 1))   # (B, OD, L)
    return input_ncl, f1, f2


# ------------------------- pure-JAX reference check ------------------------ #

def _ref_conv(x_ncl, w, b, relu):
    w_oik = jnp.transpose(w, (2, 1, 0))  # (Cout, Cin, 3)
    y = jax.lax.conv_general_dilated(
        x_ncl, w_oik, window_strides=(1,), padding="SAME",
        dimension_numbers=("NCH", "OIH", "NCH"))
    y = y + b.reshape(1, -1, 1)
    return jnp.maximum(y, 0.0) if relu else y


def _ref_forward(params, t_ncl, x_ncl):
    f0 = _ref_conv(x_ncl, *params["conv1s"], True)
    r = _ref_conv(_ref_conv(jnp.concatenate([f0, t_ncl], axis=1),
                            *params["res1a"], True), *params["res1b"], False)
    f1 = jnp.maximum(f0 + r, 0.0)
    f1 = _ref_conv(f1, *params["conv1e"], True)
    f2 = _ref_conv(f1, *params["conv2s"], True)
    r2 = _ref_conv(_ref_conv(jnp.concatenate([f2, t_ncl], axis=1),
                             *params["res2a"], True), *params["res2b"], False)
    f2 = jnp.maximum(f2 + r2, 0.0)
    f2 = _ref_conv(f2, *params["conv2e"], True)
    return x_ncl, f1, f2


# ----------------------------------- main ----------------------------------- #

if __name__ == "__main__":
    B, IN_DIM, OUT_DIM, L = 2, 16, 32, 16
    key = jax.random.PRNGKey(0)
    k_p, k_x, k_t = jax.random.split(key, 3)

    params = init_params(k_p, IN_DIM, OUT_DIM)
    x = jax.random.normal(k_x, (B, IN_DIM, L), jnp.float32)              # NCL
    t_embed = jax.random.normal(k_t, (B, TIME_EMBEDDING, L), jnp.float32)

    fwd = jax.jit(single_signal_down_forward)
    out_in, out_f1, out_f2 = jax.block_until_ready(fwd(params, t_embed, x))

    ref_in, ref_f1, ref_f2 = _ref_forward(params, t_embed, x)
    assert out_in.shape == (B, IN_DIM, L)
    assert out_f1.shape == (B, OUT_DIM, L) and out_f2.shape == (B, OUT_DIM, L)
    assert jnp.allclose(out_in, ref_in)
    assert jnp.allclose(out_f1, ref_f1, atol=1e-4, rtol=1e-4)
    assert jnp.allclose(out_f2, ref_f2, atol=1e-4, rtol=1e-4)

    print("KERNEL_OK")
</pallas_src>

<mosaic_0001>
module attributes {stable_mosaic.version = 11 : i64} {
  func.func @_fused_kernel(%arg0: i32, %arg1: memref<1x16x16xf32, #tpu.memory_space<vmem>>, %arg2: memref<1x16x32xf32, #tpu.memory_space<vmem>>, %arg3: memref<30x32x32xf32, #tpu.memory_space<vmem>>, %arg4: memref<8x1x32xf32, #tpu.memory_space<vmem>>, %arg5: memref<1x16x64xf32, #tpu.memory_space<vmem>>, %arg6: memref<18x32xf32, #tpu.memory_space<vmem>>) attributes {dimension_semantics = [#tpu.dimension_semantics<parallel>], iteration_bounds = array<i64: 2>, scalar_prefetch = 0 : i64, scratch_operands = 1 : i64, tpu.core_type = #tpu.core_type<tc>, window_params = [{transform_indices = @transform_0, window_bounds = array<i64: 1, 16, 16>}, {transform_indices = @transform_1, window_bounds = array<i64: 1, 16, 32>}, {pipeline_mode = #tpu.pipeline_mode<synchronous>, transform_indices = @transform_2, window_bounds = array<i64: 30, 32, 32>}, {pipeline_mode = #tpu.pipeline_mode<synchronous>, transform_indices = @transform_3, window_bounds = array<i64: 8, 1, 32>}, {transform_indices = @transform_4, window_bounds = array<i64: 1, 16, 64>}]} {
    %cst = arith.constant 0.000000e+00 : f32
    %0 = vector.broadcast %cst : f32 to vector<18x32xf32>
    %c0 = arith.constant 0 : index
    %c0_0 = arith.constant 0 : index
    %1 = vector.load %arg6[%c0, %c0_0] : memref<18x32xf32, #tpu.memory_space<vmem>>, vector<18x32xf32>
    tpu.vector_store %arg6[%c0, %c0_0], %0 {strides = array<i32>} : memref<18x32xf32, #tpu.memory_space<vmem>>, vector<18x32xf32>,
    %c0_1 = arith.constant 0 : index
    %c0_2 = arith.constant 0 : index
    %c0_3 = arith.constant 0 : index
    %2 = vector.load %arg1[%c0_1, %c0_2, %c0_3] : memref<1x16x16xf32, #tpu.memory_space<vmem>>, vector<1x16x16xf32>
    %3 = vector.shape_cast %2 : vector<1x16x16xf32> to vector<16x16xf32>
    %c0_4 = arith.constant 0 : index
    %c0_5 = arith.constant 0 : index
    %c0_6 = arith.constant 0 : index
    %4 = vector.load %arg2[%c0_4, %c0_5, %c0_6] : memref<1x16x32xf32, #tpu.memory_space<vmem>>, vector<1x16x32xf32>
    %5 = vector.shape_cast %4 : vector<1x16x32xf32> to vector<16x32xf32>
    %c1 = arith.constant 1 : index
    %c0_7 = arith.constant 0 : index
    %6 = vector.load %arg6[%c1, %c0_7] : memref<18x32xf32, #tpu.memory_space<vmem>>, vector<16x16xf32>
    tpu.vector_store %arg6[%c1, %c0_7], %3 {strides = array<i32>} : memref<18x32xf32, #tpu.memory_space<vmem>>, vector<16x16xf32>,
    %c0_8 = arith.constant 0 : index
    %c0_9 = arith.constant 0 : index
    %7 = vector.load %arg6[%c0_8, %c0_9] : memref<18x32xf32, #tpu.memory_space<vmem>>, vector<18x32xf32>
    %8 = vector.extract_strided_slice %7 {offsets = [0, 0], sizes = [16, 32], strides = [1, 1]} : vector<18x32xf32> to vector<16x32xf32>
    %c0_10 = arith.constant 0 : index
    %c0_11 = arith.constant 0 : index
    %c0_12 = arith.constant 0 : index
    %9 = vector.load %arg3[%c0_10, %c0_11, %c0_12] : memref<30x32x32xf32, #tpu.memory_space<vmem>>, vector<1x32x32xf32>
    %10 = vector.shape_cast %9 : vector<1x32x32xf32> to vector<32x32xf32>
    %cst_13 = arith.constant dense<0.000000e+00> : vector<16x32xf32>
    %11 = tpu.matmul %8, %10, %cst_13 {dimension_numbers = #tpu.dot_dimension_numbers<[1], [0], [0], [1], [0, 0, 1, 1], [], []>} : vector<16x32xf32>, vector<32x32xf32>, vector<16x32xf32> -> vector<16x32xf32>
    %12 = vector.extract_strided_slice %7 {offsets = [1, 0], sizes = [16, 32], strides = [1, 1]} : vector<18x32xf32> to vector<16x32xf32>
    %c1_14 = arith.constant 1 : index
    %c0_15 = arith.constant 0 : index
    %c0_16 = arith.constant 0 : index
    %13 = vector.load %arg3[%c1_14, %c0_15, %c0_16] : memref<30x32x32xf32, #tpu.memory_space<vmem>>, vector<1x32x32xf32>
    %14 = vector.shape_cast %13 : vector<1x32x32xf32> to vector<32x32xf32>
    %cst_17 = arith.constant dense<0.000000e+00> : vector<16x32xf32>
    %15 = tpu.matmul %12, %14, %cst_17 {dimension_numbers = #tpu.dot_dimension_numbers<[1], [0], [0], [1], [0, 0, 1, 1], [], []>} : vector<16x32xf32>, vector<32x32xf32>, vector<16x32xf32> -> vector<16x32xf32>
    %16 = arith.addf %11, %15 : vector<16x32xf32>
    %17 = vector.extract_strided_slice %7 {offsets = [2, 0], sizes = [16, 32], strides = [1, 1]} : vector<18x32xf32> to vector<16x32xf32>
    %c2 = arith.constant 2 : index
    %c0_18 = arith.constant 0 : index
    %c0_19 = arith.constant 0 : index
    %18 = vector.load %arg3[%c2, %c0_18, %c0_19] : memref<30x32x32xf32, #tpu.memory_space<vmem>>, vector<1x32x32xf32>
    %19 = vector.shape_cast %18 : vector<1x32x32xf32> to vector<32x32xf32>
    %cst_20 = arith.constant dense<0.000000e+00> : vector<16x32xf32>
    %20 = tpu.matmul %17, %19, %cst_20 {dimension_numbers = #tpu.dot_dimension_numbers<[1], [0], [0], [1], [0, 0, 1, 1], [], []>} : vector<16x32xf32>, vector<32x32xf32>, vector<16x32xf32> -> vector<16x32xf32>
    %21 = arith.addf %16, %20 : vector<16x32xf32>
    %c0_21 = arith.constant 0 : index
    %c0_22 = arith.constant 0 : index
    %c0_23 = arith.constant 0 : index
    %22 = vector.load %arg4[%c0_21, %c0_22, %c0_23] : memref<8x1x32xf32, #tpu.memory_space<vmem>>, vector<1x1x32xf32>
    %23 = vector.shape_cast %22 : vector<1x1x32xf32> to vector<1x32xf32>
    %24 = vector.broadcast %23 : vector<1x32xf32> to vector<16x32xf32>
    %25 = arith.addf %21, %24 : vector<16x32xf32>
    %cst_24 = arith.constant 0.000000e+00 : f32
    %26 = vector.broadcast %cst_24 : f32 to vector<16x32xf32>
    %27 = arith.maximumf %25, %26 : vector<16x32xf32>
    %c1_25 = arith.constant 1 : index
    %c0_26 = arith.constant 0 : index
    %28 = vector.load %arg6[%c1_25, %c0_26] : memref<18x32xf32, #tpu.memory_space<vmem>>, vector<16x32xf32>
    tpu.vector_store %arg6[%c1_25, %c0_26], %27 {strides = array<i32>} : memref<18x32xf32, #tpu.memory_space<vmem>>, vector<16x32xf32>,
    %c0_27 = arith.constant 0 : index
    %c0_28 = arith.constant 0 : index
    %29 = vector.load %arg6[%c0_27, %c0_28] : memref<18x32xf32, #tpu.memory_space<vmem>>, vector<18x32xf32>
    %30 = vector.extract_strided_slice %29 {offsets = [0, 0], sizes = [16, 32], strides = [1, 1]} : vector<18x32xf32> to vector<16x32xf32>
    %c3 = arith.constant 3 : index
    %c0_29 = arith.constant 0 : index
    %c0_30 = arith.constant 0 : index
    %31 = vector.load %arg3[%c3, %c0_29, %c0_30] : memref<30x32x32xf32, #tpu.memory_space<vmem>>, vector<1x32x32xf32>
    %32 = vector.shape_cast %31 : vector<1x32x32xf32> to vector<32x32xf32>
    %cst_31 = arith.constant dense<0.000000e+00> : vector<16x32xf32>
    %33 = tpu.matmul %30, %32, %cst_31 {dimension_numbers = #tpu.dot_dimension_numbers<[1], [0], [0], [1], [0, 0, 1, 1], [], []>} : vector<16x32xf32>, vector<32x32xf32>, vector<16x32xf32> -> vector<16x32xf32>
    %34 = vector.extract_strided_slice %29 {offsets = [1, 0], sizes = [16, 32], strides = [1, 1]} : vector<18x32xf32> to vector<16x32xf32>
    %c4 = arith.constant 4 : index
    %c0_32 = arith.constant 0 : index
    %c0_33 = arith.constant 0 : index
    %35 = vector.load %arg3[%c4, %c0_32, %c0_33] : memref<30x32x32xf32, #tpu.memory_space<vmem>>, vector<1x32x32xf32>
    %36 = vector.shape_cast %35 : vector<1x32x32xf32> to vector<32x32xf32>
    %cst_34 = arith.constant dense<0.000000e+00> : vector<16x32xf32>
    %37 = tpu.matmul %34, %36, %cst_34 {dimension_numbers = #tpu.dot_dimension_numbers<[1], [0], [0], [1], [0, 0, 1, 1], [], []>} : vector<16x32xf32>, vector<32x32xf32>, vector<16x32xf32> -> vector<16x32xf32>
    %38 = arith.addf %33, %37 : vector<16x32xf32>
    %39 = vector.extract_strided_slice %29 {offsets = [2, 0], sizes = [16, 32], strides = [1, 1]} : vector<18x32xf32> to vector<16x32xf32>
    %c5 = arith.constant 5 : index
    %c0_35 = arith.constant 0 : index
    %c0_36 = arith.constant 0 : index
    %40 = vector.load %arg3[%c5, %c0_35, %c0_36] : memref<30x32x32xf32, #tpu.memory_space<vmem>>, vector<1x32x32xf32>
    %41 = vector.shape_cast %40 : vector<1x32x32xf32> to vector<32x32xf32>
    %cst_37 = arith.constant dense<0.000000e+00> : vector<16x32xf32>
    %42 = tpu.matmul %39, %41, %cst_37 {dimension_numbers = #tpu.dot_dimension_numbers<[1], [0], [0], [1], [0, 0, 1, 1], [], []>} : vector<16x32xf32>, vector<32x32xf32>, vector<16x32xf32> -> vector<16x32xf32>
    %43 = arith.addf %38, %42 : vector<16x32xf32>
    %c1_38 = arith.constant 1 : index
    %c0_39 = arith.constant 0 : index
    %44 = vector.load %arg6[%c1_38, %c0_39] : memref<18x32xf32, #tpu.memory_space<vmem>>, vector<16x32xf32>
    tpu.vector_store %arg6[%c1_38, %c0_39], %5 {strides = array<i32>} : memref<18x32xf32, #tpu.memory_space<vmem>>, vector<16x32xf32>,
    %c0_40 = arith.constant 0 : index
    %c0_41 = arith.constant 0 : index
    %45 = vector.load %arg6[%c0_40, %c0_41] : memref<18x32xf32, #tpu.memory_space<vmem>>, vector<18x32xf32>
    %46 = vector.extract_strided_slice %45 {offsets = [0, 0], sizes = [16, 32], strides = [1, 1]} : vector<18x32xf32> to vector<16x32xf32>
    %c6 = arith.constant 6 : index
    %c0_42 = arith.constant 0 : index
    %c0_43 = arith.constant 0 : index
    %47 = vector.load %arg3[%c6, %c0_42, %c0_43] : memref<30x32x32xf32, #tpu.memory_space<vmem>>, vector<1x32x32xf32>
    %48 = vector.shape_cast %47 : vector<1x32x32xf32> to vector<32x32xf32>
    %cst_44 = arith.constant dense<0.000000e+00> : vector<16x32xf32>
    %49 = tpu.matmul %46, %48, %cst_44 {dimension_numbers = #tpu.dot_dimension_numbers<[1], [0], [0], [1], [0, 0, 1, 1], [], []>} : vector<16x32xf32>, vector<32x32xf32>, vector<16x32xf32> -> vector<16x32xf32>
    %50 = arith.addf %43, %49 : vector<16x32xf32>
    %51 = vector.extract_strided_slice %45 {offsets = [1, 0], sizes = [16, 32], strides = [1, 1]} : vector<18x32xf32> to vector<16x32xf32>
    %c7 = arith.constant 7 : index
    %c0_45 = arith.constant 0 : index
    %c0_46 = arith.constant 0 : index
    %52 = vector.load %arg3[%c7, %c0_45, %c0_46] : memref<30x32x32xf32, #tpu.memory_space<vmem>>, vector<1x32x32xf32>
    %53 = vector.shape_cast %52 : vector<1x32x32xf32> to vector<32x32xf32>
    %cst_47 = arith.constant dense<0.000000e+00> : vector<16x32xf32>
    %54 = tpu.matmul %51, %53, %cst_47 {dimension_numbers = #tpu.dot_dimension_numbers<[1], [0], [0], [1], [0, 0, 1, 1], [], []>} : vector<16x32xf32>, vector<32x32xf32>, vector<16x32xf32> -> vector<16x32xf32>
    %55 = arith.addf %50, %54 : vector<16x32xf32>
    %56 = vector.extract_strided_slice %45 {offsets = [2, 0], sizes = [16, 32], strides = [1, 1]} : vector<18x32xf32> to vector<16x32xf32>
    %c8 = arith.constant 8 : index
    %c0_48 = arith.constant 0 : index
    %c0_49 = arith.constant 0 : index
    %57 = vector.load %arg3[%c8, %c0_48, %c0_49] : memref<30x32x32xf32, #tpu.memory_space<vmem>>, vector<1x32x32xf32>
    %58 = vector.shape_cast %57 : vector<1x32x32xf32> to vector<32x32xf32>
    %cst_50 = arith.constant dense<0.000000e+00> : vector<16x32xf32>
    %59 = tpu.matmul %56, %58, %cst_50 {dimension_numbers = #tpu.dot_dimension_numbers<[1], [0], [0], [1], [0, 0, 1, 1], [], []>} : vector<16x32xf32>, vector<32x32xf32>, vector<16x32xf32> -> vector<16x32xf32>
    %60 = arith.addf %55, %59 : vector<16x32xf32>
    %c1_51 = arith.constant 1 : index
    %c0_52 = arith.constant 0 : index
    %c0_53 = arith.constant 0 : index
    %61 = vector.load %arg4[%c1_51, %c0_52, %c0_53] : memref<8x1x32xf32, #tpu.memory_space<vmem>>, vector<1x1x32xf32>
    %62 = vector.shape_cast %61 : vector<1x1x32xf32> to vector<1x32xf32>
    %63 = vector.broadcast %62 : vector<1x32xf32> to vector<16x32xf32>
    %64 = arith.addf %60, %63 : vector<16x32xf32>
    %cst_54 = arith.constant 0.000000e+00 : f32
    %65 = vector.broadcast %cst_54 : f32 to vector<16x32xf32>
    %66 = arith.maximumf %64, %65 : vector<16x32xf32>
    %c1_55 = arith.constant 1 : index
    %c0_56 = arith.constant 0 : index
    %67 = vector.load %arg6[%c1_55, %c0_56] : memref<18x32xf32, #tpu.memory_space<vmem>>, vector<16x32xf32>
    tpu.vector_store %arg6[%c1_55, %c0_56], %66 {strides = array<i32>} : memref<18x32xf32, #tpu.memory_space<vmem>>, vector<16x32xf32>,
    %c0_57 = arith.constant 0 : index
    %c0_58 = arith.constant 0 : index
    %68 = vector.load %arg6[%c0_57, %c0_58] : memref<18x32xf32, #tpu.memory_space<vmem>>, vector<18x32xf32>
    %69 = vector.extract_strided_slice %68 {offsets = [0, 0], sizes = [16, 32], strides = [1, 1]} : vector<18x32xf32> to vector<16x32xf32>
    %c9 = arith.constant 9 : index
    %c0_59 = arith.constant 0 : index
    %c0_60 = arith.constant 0 : index
    %70 = vector.load %arg3[%c9, %c0_59, %c0_60] : memref<30x32x32xf32, #tpu.memory_space<vmem>>, vector<1x32x32xf32>
    %71 = vector.shape_cast %70 : vector<1x32x32xf32> to vector<32x32xf32>
    %cst_61 = arith.constant dense<0.000000e+00> : vector<16x32xf32>
    %72 = tpu.matmul %69, %71, %cst_61 {dimension_numbers = #tpu.dot_dimension_numbers<[1], [0], [0], [1], [0, 0, 1, 1], [], []>} : vector<16x32xf32>, vector<32x32xf32>, vector<16x32xf32> -> vector<16x32xf32>
    %73 = vector.extract_strided_slice %68 {offsets = [1, 0], sizes = [16, 32], strides = [1, 1]} : vector<18x32xf32> to vector<16x32xf32>
    %c10 = arith.constant 10 : index
    %c0_62 = arith.constant 0 : index
    %c0_63 = arith.constant 0 : index
    %74 = vector.load %arg3[%c10, %c0_62, %c0_63] : memref<30x32x32xf32, #tpu.memory_space<vmem>>, vector<1x32x32xf32>
    %75 = vector.shape_cast %74 : vector<1x32x32xf32> to vector<32x32xf32>
    %cst_64 = arith.constant dense<0.000000e+00> : vector<16x32xf32>
    %76 = tpu.matmul %73, %75, %cst_64 {dimension_numbers = #tpu.dot_dimension_numbers<[1], [0], [0], [1], [0, 0, 1, 1], [], []>} : vector<16x32xf32>, vector<32x32xf32>, vector<16x32xf32> -> vector<16x32xf32>
    %77 = arith.addf %72, %76 : vector<16x32xf32>
    %78 = vector.extract_strided_slice %68 {offsets = [2, 0], sizes = [16, 32], strides = [1, 1]} : vector<18x32xf32> to vector<16x32xf32>
    %c11 = arith.constant 11 : index
    %c0_65 = arith.constant 0 : index
    %c0_66 = arith.constant 0 : index
    %79 = vector.load %arg3[%c11, %c0_65, %c0_66] : memref<30x32x32xf32, #tpu.memory_space<vmem>>, vector<1x32x32xf32>
    %80 = vector.shape_cast %79 : vector<1x32x32xf32> to vector<32x32xf32>
    %cst_67 = arith.constant dense<0.000000e+00> : vector<16x32xf32>
    %81 = tpu.matmul %78, %80, %cst_67 {dimension_numbers = #tpu.dot_dimension_numbers<[1], [0], [0], [1], [0, 0, 1, 1], [], []>} : vector<16x32xf32>, vector<32x32xf32>, vector<16x32xf32> -> vector<16x32xf32>
    %82 = arith.addf %77, %81 : vector<16x32xf32>
    %c2_68 = arith.constant 2 : index
    %c0_69 = arith.constant 0 : index
    %c0_70 = arith.constant 0 : index
    %83 = vector.load %arg4[%c2_68, %c0_69, %c0_70] : memref<8x1x32xf32, #tpu.memory_space<vmem>>, vector<1x1x32xf32>
    %84 = vector.shape_cast %83 : vector<1x1x32xf32> to vector<1x32xf32>
    %85 = vector.broadcast %84 : vector<1x32xf32> to vector<16x32xf32>
    %86 = arith.addf %82, %85 : vector<16x32xf32>
    %87 = arith.addf %86, %27 : vector<16x32xf32>
    %cst_71 = arith.constant 0.000000e+00 : f32
    %88 = vector.broadcast %cst_71 : f32 to vector<16x32xf32>
    %89 = arith.maximumf %87, %88 : vector<16x32xf32>
    %c1_72 = arith.constant 1 : index
    %c0_73 = arith.constant 0 : index
    %90 = vector.load %arg6[%c1_72, %c0_73] : memref<18x32xf32, #tpu.memory_space<vmem>>, vector<16x32xf32>
    tpu.vector_store %arg6[%c1_72, %c0_73], %89 {strides = array<i32>} : memref<18x32xf32, #tpu.memory_space<vmem>>, vector<16x32xf32>,
    %c0_74 = arith.constant 0 : index
    %c0_75 = arith.constant 0 : index
    %91 = vector.load %arg6[%c0_74, %c0_75] : memref<18x32xf32, #tpu.memory_space<vmem>>, vector<18x32xf32>
    %92 = vector.extract_strided_slice %91 {offsets = [0, 0], sizes = [16, 32], strides = [1, 1]} : vector<18x32xf32> to vector<16x32xf32>
    %c12 = arith.constant 12 : index
    %c0_76 = arith.constant 0 : index
    %c0_77 = arith.constant 0 : index
    %93 = vector.load %arg3[%c12, %c0_76, %c0_77] : memref<30x32x32xf32, #tpu.memory_space<vmem>>, vector<1x32x32xf32>
    %94 = vector.shape_cast %93 : vector<1x32x32xf32> to vector<32x32xf32>
    %cst_78 = arith.constant dense<0.000000e+00> : vector<16x32xf32>
    %95 = tpu.matmul %92, %94, %cst_78 {dimension_numbers = #tpu.dot_dimension_numbers<[1], [0], [0], [1], [0, 0, 1, 1], [], []>} : vector<16x32xf32>, vector<32x32xf32>, vector<16x32xf32> -> vector<16x32xf32>
    %96 = vector.extract_strided_slice %91 {offsets = [1, 0], sizes = [16, 32], strides = [1, 1]} : vector<18x32xf32> to vector<16x32xf32>
    %c13 = arith.constant 13 : index
    %c0_79 = arith.constant 0 : index
    %c0_80 = arith.constant 0 : index
    %97 = vector.load %arg3[%c13, %c0_79, %c0_80] : memref<30x32x32xf32, #tpu.memory_space<vmem>>, vector<1x32x32xf32>
    %98 = vector.shape_cast %97 : vector<1x32x32xf32> to vector<32x32xf32>
    %cst_81 = arith.constant dense<0.000000e+00> : vector<16x32xf32>
    %99 = tpu.matmul %96, %98, %cst_81 {dimension_numbers = #tpu.dot_dimension_numbers<[1], [0], [0], [1], [0, 0, 1, 1], [], []>} : vector<16x32xf32>, vector<32x32xf32>, vector<16x32xf32> -> vector<16x32xf32>
    %100 = arith.addf %95, %99 : vector<16x32xf32>
    %101 = vector.extract_strided_slice %91 {offsets = [2, 0], sizes = [16, 32], strides = [1, 1]} : vector<18x32xf32> to vector<16x32xf32>
    %c14 = arith.constant 14 : index
    %c0_82 = arith.constant 0 : index
    %c0_83 = arith.constant 0 : index
    %102 = vector.load %arg3[%c14, %c0_82, %c0_83] : memref<30x32x32xf32, #tpu.memory_space<vmem>>, vector<1x32x32xf32>
    %103 = vector.shape_cast %102 : vector<1x32x32xf32> to vector<32x32xf32>
    %cst_84 = arith.constant dense<0.000000e+00> : vector<16x32xf32>
    %104 = tpu.matmul %101, %103, %cst_84 {dimension_numbers = #tpu.dot_dimension_numbers<[1], [0], [0], [1], [0, 0, 1, 1], [], []>} : vector<16x32xf32>, vector<32x32xf32>, vector<16x32xf32> -> vector<16x32xf32>
    %105 = arith.addf %100, %104 : vector<16x32xf32>
    %c3_85 = arith.constant 3 : index
    %c0_86 = arith.constant 0 : index
    %c0_87 = arith.constant 0 : index
    %106 = vector.load %arg4[%c3_85, %c0_86, %c0_87] : memref<8x1x32xf32, #tpu.memory_space<vmem>>, vector<1x1x32xf32>
    %107 = vector.shape_cast %106 : vector<1x1x32xf32> to vector<1x32xf32>
    %108 = vector.broadcast %107 : vector<1x32xf32> to vector<16x32xf32>
    %109 = arith.addf %105, %108 : vector<16x32xf32>
    %cst_88 = arith.constant 0.000000e+00 : f32
    %110 = vector.broadcast %cst_88 : f32 to vector<16x32xf32>
    %111 = arith.maximumf %109, %110 : vector<16x32xf32>
    %c1_89 = arith.constant 1 : index
    %c0_90 = arith.constant 0 : index
    %112 = vector.load %arg6[%c1_89, %c0_90] : memref<18x32xf32, #tpu.memory_space<vmem>>, vector<16x32xf32>
    tpu.vector_store %arg6[%c1_89, %c0_90], %111 {strides = array<i32>} : memref<18x32xf32, #tpu.memory_space<vmem>>, vector<16x32xf32>,
    %c0_91 = arith.constant 0 : index
    %c0_92 = arith.constant 0 : index
    %113 = vector.load %arg6[%c0_91, %c0_92] : memref<18x32xf32, #tpu.memory_space<vmem>>, vector<18x32xf32>
    %114 = vector.extract_strided_slice %113 {offsets = [0, 0], sizes = [16, 32], strides = [1, 1]} : vector<18x32xf32> to vector<16x32xf32>
    %c15 = arith.constant 15 : index
    %c0_93 = arith.constant 0 : index
    %c0_94 = arith.constant 0 : index
    %115 = vector.load %arg3[%c15, %c0_93, %c0_94] : memref<30x32x32xf32, #tpu.memory_space<vmem>>, vector<1x32x32xf32>
    %116 = vector.shape_cast %115 : vector<1x32x32xf32> to vector<32x32xf32>
    %cst_95 = arith.constant dense<0.000000e+00> : vector<16x32xf32>
    %117 = tpu.matmul %114, %116, %cst_95 {dimension_numbers = #tpu.dot_dimension_numbers<[1], [0], [0], [1], [0, 0, 1, 1], [], []>} : vector<16x32xf32>, vector<32x32xf32>, vector<16x32xf32> -> vector<16x32xf32>
    %118 = vector.extract_strided_slice %113 {offsets = [1, 0], sizes = [16, 32], strides = [1, 1]} : vector<18x32xf32> to vector<16x32xf32>
    %c16 = arith.constant 16 : index
    %c0_96 = arith.constant 0 : index
    %c0_97 = arith.constant 0 : index
    %119 = vector.load %arg3[%c16, %c0_96, %c0_97] : memref<30x32x32xf32, #tpu.memory_space<vmem>>, vector<1x32x32xf32>
    %120 = vector.shape_cast %119 : vector<1x32x32xf32> to vector<32x32xf32>
    %cst_98 = arith.constant dense<0.000000e+00> : vector<16x32xf32>
    %121 = tpu.matmul %118, %120, %cst_98 {dimension_numbers = #tpu.dot_dimension_numbers<[1], [0], [0], [1], [0, 0, 1, 1], [], []>} : vector<16x32xf32>, vector<32x32xf32>, vector<16x32xf32> -> vector<16x32xf32>
    %122 = arith.addf %117, %121 : vector<16x32xf32>
    %123 = vector.extract_strided_slice %113 {offsets = [2, 0], sizes = [16, 32], strides = [1, 1]} : vector<18x32xf32> to vector<16x32xf32>
    %c17 = arith.constant 17 : index
    %c0_99 = arith.constant 0 : index
    %c0_100 = arith.constant 0 : index
    %124 = vector.load %arg3[%c17, %c0_99, %c0_100] : memref<30x32x32xf32, #tpu.memory_space<vmem>>, vector<1x32x32xf32>
    %125 = vector.shape_cast %124 : vector<1x32x32xf32> to vector<32x32xf32>
    %cst_101 = arith.constant dense<0.000000e+00> : vector<16x32xf32>
    %126 = tpu.matmul %123, %125, %cst_101 {dimension_numbers = #tpu.dot_dimension_numbers<[1], [0], [0], [1], [0, 0, 1, 1], [], []>} : vector<16x32xf32>, vector<32x32xf32>, vector<16x32xf32> -> vector<16x32xf32>
    %127 = arith.addf %122, %126 : vector<16x32xf32>
    %c4_102 = arith.constant 4 : index
    %c0_103 = arith.constant 0 : index
    %c0_104 = arith.constant 0 : index
    %128 = vector.load %arg4[%c4_102, %c0_103, %c0_104] : memref<8x1x32xf32, #tpu.memory_space<vmem>>, vector<1x1x32xf32>
    %129 = vector.shape_cast %128 : vector<1x1x32xf32> to vector<1x32xf32>
    %130 = vector.broadcast %129 : vector<1x32xf32> to vector<16x32xf32>
    %131 = arith.addf %127, %130 : vector<16x32xf32>
    %cst_105 = arith.constant 0.000000e+00 : f32
    %132 = vector.broadcast %cst_105 : f32 to vector<16x32xf32>
    %133 = arith.maximumf %131, %132 : vector<16x32xf32>
    %c1_106 = arith.constant 1 : index
    %c0_107 = arith.constant 0 : index
    %134 = vector.load %arg6[%c1_106, %c0_107] : memref<18x32xf32, #tpu.memory_space<vmem>>, vector<16x32xf32>
    tpu.vector_store %arg6[%c1_106, %c0_107], %133 {strides = array<i32>} : memref<18x32xf32, #tpu.memory_space<vmem>>, vector<16x32xf32>,
    %c0_108 = arith.constant 0 : index
    %c0_109 = arith.constant 0 : index
    %135 = vector.load %arg6[%c0_108, %c0_109] : memref<18x32xf32, #tpu.memory_space<vmem>>, vector<18x32xf32>
    %136 = vector.extract_strided_slice %135 {offsets = [0, 0], sizes = [16, 32], strides = [1, 1]} : vector<18x32xf32> to vector<16x32xf32>
    %c18 = arith.constant 18 : index
    %c0_110 = arith.constant 0 : index
    %c0_111 = arith.constant 0 : index
    %137 = vector.load %arg3[%c18, %c0_110, %c0_111] : memref<30x32x32xf32, #tpu.memory_space<vmem>>, vector<1x32x32xf32>
    %138 = vector.shape_cast %137 : vector<1x32x32xf32> to vector<32x32xf32>
    %cst_112 = arith.constant dense<0.000000e+00> : vector<16x32xf32>
    %139 = tpu.matmul %136, %138, %cst_112 {dimension_numbers = #tpu.dot_dimension_numbers<[1], [0], [0], [1], [0, 0, 1, 1], [], []>} : vector<16x32xf32>, vector<32x32xf32>, vector<16x32xf32> -> vector<16x32xf32>
    %140 = vector.extract_strided_slice %135 {offsets = [1, 0], sizes = [16, 32], strides = [1, 1]} : vector<18x32xf32> to vector<16x32xf32>
    %c19 = arith.constant 19 : index
    %c0_113 = arith.constant 0 : index
    %c0_114 = arith.constant 0 : index
    %141 = vector.load %arg3[%c19, %c0_113, %c0_114] : memref<30x32x32xf32, #tpu.memory_space<vmem>>, vector<1x32x32xf32>
    %142 = vector.shape_cast %141 : vector<1x32x32xf32> to vector<32x32xf32>
    %cst_115 = arith.constant dense<0.000000e+00> : vector<16x32xf32>
    %143 = tpu.matmul %140, %142, %cst_115 {dimension_numbers = #tpu.dot_dimension_numbers<[1], [0], [0], [1], [0, 0, 1, 1], [], []>} : vector<16x32xf32>, vector<32x32xf32>, vector<16x32xf32> -> vector<16x32xf32>
    %144 = arith.addf %139, %143 : vector<16x32xf32>
    %145 = vector.extract_strided_slice %135 {offsets = [2, 0], sizes = [16, 32], strides = [1, 1]} : vector<18x32xf32> to vector<16x32xf32>
    %c20 = arith.constant 20 : index
    %c0_116 = arith.constant 0 : index
    %c0_117 = arith.constant 0 : index
    %146 = vector.load %arg3[%c20, %c0_116, %c0_117] : memref<30x32x32xf32, #tpu.memory_space<vmem>>, vector<1x32x32xf32>
    %147 = vector.shape_cast %146 : vector<1x32x32xf32> to vector<32x32xf32>
    %cst_118 = arith.constant dense<0.000000e+00> : vector<16x32xf32>
    %148 = tpu.matmul %145, %147, %cst_118 {dimension_numbers = #tpu.dot_dimension_numbers<[1], [0], [0], [1], [0, 0, 1, 1], [], []>} : vector<16x32xf32>, vector<32x32xf32>, vector<16x32xf32> -> vector<16x32xf32>
    %149 = arith.addf %144, %148 : vector<16x32xf32>
    %c1_119 = arith.constant 1 : index
    %c0_120 = arith.constant 0 : index
    %150 = vector.load %arg6[%c1_119, %c0_120] : memref<18x32xf32, #tpu.memory_space<vmem>>, vector<16x32xf32>
    tpu.vector_store %arg6[%c1_119, %c0_120], %5 {strides = array<i32>} : memref<18x32xf32, #tpu.memory_space<vmem>>, vector<16x32xf32>,
    %c0_121 = arith.constant 0 : index
    %c0_122 = arith.constant 0 : index
    %151 = vector.load %arg6[%c0_121, %c0_122] : memref<18x32xf32, #tpu.memory_space<vmem>>, vector<18x32xf32>
    %152 = vector.extract_strided_slice %151 {offsets = [0, 0], sizes = [16, 32], strides = [1, 1]} : vector<18x32xf32> to vector<16x32xf32>
    %c21 = arith.constant 21 : index
    %c0_123 = arith.constant 0 : index
    %c0_124 = arith.constant 0 : index
    %153 = vector.load %arg3[%c21, %c0_123, %c0_124] : memref<30x32x32xf32, #tpu.memory_space<vmem>>, vector<1x32x32xf32>
    %154 = vector.shape_cast %153 : vector<1x32x32xf32> to vector<32x32xf32>
    %cst_125 = arith.constant dense<0.000000e+00> : vector<16x32xf32>
    %155 = tpu.matmul %152, %154, %cst_125 {dimension_numbers = #tpu.dot_dimension_numbers<[1], [0], [0], [1], [0, 0, 1, 1], [], []>} : vector<16x32xf32>, vector<32x32xf32>, vector<16x32xf32> -> vector<16x32xf32>
    %156 = arith.addf %149, %155 : vector<16x32xf32>
    %157 = vector.extract_strided_slice %151 {offsets = [1, 0], sizes = [16, 32], strides = [1, 1]} : vector<18x32xf32> to vector<16x32xf32>
    %c22 = arith.constant 22 : index
    %c0_126 = arith.constant 0 : index
    %c0_127 = arith.constant 0 : index
    %158 = vector.load %arg3[%c22, %c0_126, %c0_127] : memref<30x32x32xf32, #tpu.memory_space<vmem>>, vector<1x32x32xf32>
    %159 = vector.shape_cast %158 : vector<1x32x32xf32> to vector<32x32xf32>
    %cst_128 = arith.constant dense<0.000000e+00> : vector<16x32xf32>
    %160 = tpu.matmul %157, %159, %cst_128 {dimension_numbers = #tpu.dot_dimension_numbers<[1], [0], [0], [1], [0, 0, 1, 1], [], []>} : vector<16x32xf32>, vector<32x32xf32>, vector<16x32xf32> -> vector<16x32xf32>
    %161 = arith.addf %156, %160 : vector<16x32xf32>
    %162 = vector.extract_strided_slice %151 {offsets = [2, 0], sizes = [16, 32], strides = [1, 1]} : vector<18x32xf32> to vector<16x32xf32>
    %c23 = arith.constant 23 : index
    %c0_129 = arith.constant 0 : index
    %c0_130 = arith.constant 0 : index
    %163 = vector.load %arg3[%c23, %c0_129, %c0_130] : memref<30x32x32xf32, #tpu.memory_space<vmem>>, vector<1x32x32xf32>
    %164 = vector.shape_cast %163 : vector<1x32x32xf32> to vector<32x32xf32>
    %cst_131 = arith.constant dense<0.000000e+00> : vector<16x32xf32>
    %165 = tpu.matmul %162, %164, %cst_131 {dimension_numbers = #tpu.dot_dimension_numbers<[1], [0], [0], [1], [0, 0, 1, 1], [], []>} : vector<16x32xf32>, vector<32x32xf32>, vector<16x32xf32> -> vector<16x32xf32>
    %166 = arith.addf %161, %165 : vector<16x32xf32>
    %c5_132 = arith.constant 5 : index
    %c0_133 = arith.constant 0 : index
    %c0_134 = arith.constant 0 : index
    %167 = vector.load %arg4[%c5_132, %c0_133, %c0_134] : memref<8x1x32xf32, #tpu.memory_space<vmem>>, vector<1x1x32xf32>
    %168 = vector.shape_cast %167 : vector<1x1x32xf32> to vector<1x32xf32>
    %169 = vector.broadcast %168 : vector<1x32xf32> to vector<16x32xf32>
    %170 = arith.addf %166, %169 : vector<16x32xf32>
    %cst_135 = arith.constant 0.000000e+00 : f32
    %171 = vector.broadcast %cst_135 : f32 to vector<16x32xf32>
    %172 = arith.maximumf %170, %171 : vector<16x32xf32>
    %c1_136 = arith.constant 1 : index
    %c0_137 = arith.constant 0 : index
    %173 = vector.load %arg6[%c1_136, %c0_137] : memref<18x32xf32, #tpu.memory_space<vmem>>, vector<16x32xf32>
    tpu.vector_store %arg6[%c1_136, %c0_137], %172 {strides = array<i32>} : memref<18x32xf32, #tpu.memory_space<vmem>>, vector<16x32xf32>,
    %c0_138 = arith.constant 0 : index
    %c0_139 = arith.constant 0 : index
    %174 = vector.load %arg6[%c0_138, %c0_139] : memref<18x32xf32, #tpu.memory_space<vmem>>, vector<18x32xf32>
    %175 = vector.extract_strided_slice %174 {offsets = [0, 0], sizes = [16, 32], strides = [1, 1]} : vector<18x32xf32> to vector<16x32xf32>
    %c24 = arith.constant 24 : index
    %c0_140 = arith.constant 0 : index
    %c0_141 = arith.constant 0 : index
    %176 = vector.load %arg3[%c24, %c0_140, %c0_141] : memref<30x32x32xf32, #tpu.memory_space<vmem>>, vector<1x32x32xf32>
    %177 = vector.shape_cast %176 : vector<1x32x32xf32> to vector<32x32xf32>
    %cst_142 = arith.constant dense<0.000000e+00> : vector<16x32xf32>
    %178 = tpu.matmul %175, %177, %cst_142 {dimension_numbers = #tpu.dot_dimension_numbers<[1], [0], [0], [1], [0, 0, 1, 1], [], []>} : vector<16x32xf32>, vector<32x32xf32>, vector<16x32xf32> -> vector<16x32xf32>
    %179 = vector.extract_strided_slice %174 {offsets = [1, 0], sizes = [16, 32], strides = [1, 1]} : vector<18x32xf32> to vector<16x32xf32>
    %c25 = arith.constant 25 : index
    %c0_143 = arith.constant 0 : index
    %c0_144 = arith.constant 0 : index
    %180 = vector.load %arg3[%c25, %c0_143, %c0_144] : memref<30x32x32xf32, #tpu.memory_space<vmem>>, vector<1x32x32xf32>
    %181 = vector.shape_cast %180 : vector<1x32x32xf32> to vector<32x32xf32>
    %cst_145 = arith.constant dense<0.000000e+00> : vector<16x32xf32>
    %182 = tpu.matmul %179, %181, %cst_145 {dimension_numbers = #tpu.dot_dimension_numbers<[1], [0], [0], [1], [0, 0, 1, 1], [], []>} : vector<16x32xf32>, vector<32x32xf32>, vector<16x32xf32> -> vector<16x32xf32>
    %183 = arith.addf %178, %182 : vector<16x32xf32>
    %184 = vector.extract_strided_slice %174 {offsets = [2, 0], sizes = [16, 32], strides = [1, 1]} : vector<18x32xf32> to vector<16x32xf32>
    %c26 = arith.constant 26 : index
    %c0_146 = arith.constant 0 : index
    %c0_147 = arith.constant 0 : index
    %185 = vector.load %arg3[%c26, %c0_146, %c0_147] : memref<30x32x32xf32, #tpu.memory_space<vmem>>, vector<1x32x32xf32>
    %186 = vector.shape_cast %185 : vector<1x32x32xf32> to vector<32x32xf32>
    %cst_148 = arith.constant dense<0.000000e+00> : vector<16x32xf32>
    %187 = tpu.matmul %184, %186, %cst_148 {dimension_numbers = #tpu.dot_dimension_numbers<[1], [0], [0], [1], [0, 0, 1, 1], [], []>} : vector<16x32xf32>, vector<32x32xf32>, vector<16x32xf32> -> vector<16x32xf32>
    %188 = arith.addf %183, %187 : vector<16x32xf32>
    %c6_149 = arith.constant 6 : index
    %c0_150 = arith.constant 0 : index
    %c0_151 = arith.constant 0 : index
    %189 = vector.load %arg4[%c6_149, %c0_150, %c0_151] : memref<8x1x32xf32, #tpu.memory_space<vmem>>, vector<1x1x32xf32>
    %190 = vector.shape_cast %189 : vector<1x1x32xf32> to vector<1x32xf32>
    %191 = vector.broadcast %190 : vector<1x32xf32> to vector<16x32xf32>
    %192 = arith.addf %188, %191 : vector<16x32xf32>
    %193 = arith.addf %192, %133 : vector<16x32xf32>
    %cst_152 = arith.constant 0.000000e+00 : f32
    %194 = vector.broadcast %cst_152 : f32 to vector<16x32xf32>
    %195 = arith.maximumf %193, %194 : vector<16x32xf32>
    %c1_153 = arith.constant 1 : index
    %c0_154 = arith.constant 0 : index
    %196 = vector.load %arg6[%c1_153, %c0_154] : memref<18x32xf32, #tpu.memory_space<vmem>>, vector<16x32xf32>
    tpu.vector_store %arg6[%c1_153, %c0_154], %195 {strides = array<i32>} : memref<18x32xf32, #tpu.memory_space<vmem>>, vector<16x32xf32>,
    %c0_155 = arith.constant 0 : index
    %c0_156 = arith.constant 0 : index
    %197 = vector.load %arg6[%c0_155, %c0_156] : memref<18x32xf32, #tpu.memory_space<vmem>>, vector<18x32xf32>
    %198 = vector.extract_strided_slice %197 {offsets = [0, 0], sizes = [16, 32], strides = [1, 1]} : vector<18x32xf32> to vector<16x32xf32>
    %c27 = arith.constant 27 : index
    %c0_157 = arith.constant 0 : index
    %c0_158 = arith.constant 0 : index
    %199 = vector.load %arg3[%c27, %c0_157, %c0_158] : memref<30x32x32xf32, #tpu.memory_space<vmem>>, vector<1x32x32xf32>
    %200 = vector.shape_cast %199 : vector<1x32x32xf32> to vector<32x32xf32>
    %cst_159 = arith.constant dense<0.000000e+00> : vector<16x32xf32>
    %201 = tpu.matmul %198, %200, %cst_159 {dimension_numbers = #tpu.dot_dimension_numbers<[1], [0], [0], [1], [0, 0, 1, 1], [], []>} : vector<16x32xf32>, vector<32x32xf32>, vector<16x32xf32> -> vector<16x32xf32>
    %202 = vector.extract_strided_slice %197 {offsets = [1, 0], sizes = [16, 32], strides = [1, 1]} : vector<18x32xf32> to vector<16x32xf32>
    %c28 = arith.constant 28 : index
    %c0_160 = arith.constant 0 : index
    %c0_161 = arith.constant 0 : index
    %203 = vector.load %arg3[%c28, %c0_160, %c0_161] : memref<30x32x32xf32, #tpu.memory_space<vmem>>, vector<1x32x32xf32>
    %204 = vector.shape_cast %203 : vector<1x32x32xf32> to vector<32x32xf32>
    %cst_162 = arith.constant dense<0.000000e+00> : vector<16x32xf32>
    %205 = tpu.matmul %202, %204, %cst_162 {dimension_numbers = #tpu.dot_dimension_numbers<[1], [0], [0], [1], [0, 0, 1, 1], [], []>} : vector<16x32xf32>, vector<32x32xf32>, vector<16x32xf32> -> vector<16x32xf32>
    %206 = arith.addf %201, %205 : vector<16x32xf32>
    %207 = vector.extract_strided_slice %197 {offsets = [2, 0], sizes = [16, 32], strides = [1, 1]} : vector<18x32xf32> to vector<16x32xf32>
    %c29 = arith.constant 29 : index
    %c0_163 = arith.constant 0 : index
    %c0_164 = arith.constant 0 : index
    %208 = vector.load %arg3[%c29, %c0_163, %c0_164] : memref<30x32x32xf32, #tpu.memory_space<vmem>>, vector<1x32x32xf32>
    %209 = vector.shape_cast %208 : vector<1x32x32xf32> to vector<32x32xf32>
    %cst_165 = arith.constant dense<0.000000e+00> : vector<16x32xf32>
    %210 = tpu.matmul %207, %209, %cst_165 {dimension_numbers = #tpu.dot_dimension_numbers<[1], [0], [0], [1], [0, 0, 1, 1], [], []>} : vector<16x32xf32>, vector<32x32xf32>, vector<16x32xf32> -> vector<16x32xf32>
    %211 = arith.addf %206, %210 : vector<16x32xf32>
    %c7_166 = arith.constant 7 : index
    %c0_167 = arith.constant 0 : index
    %c0_168 = arith.constant 0 : index
    %212 = vector.load %arg4[%c7_166, %c0_167, %c0_168] : memref<8x1x32xf32, #tpu.memory_space<vmem>>, vector<1x1x32xf32>
    %213 = vector.shape_cast %212 : vector<1x1x32xf32> to vector<1x32xf32>
    %214 = vector.broadcast %213 : vector<1x32xf32> to vector<16x32xf32>
    %215 = arith.addf %211, %214 : vector<16x32xf32>
    %cst_169 = arith.constant 0.000000e+00 : f32
    %216 = vector.broadcast %cst_169 : f32 to vector<16x32xf32>
    %217 = arith.maximumf %215, %216 : vector<16x32xf32>
    %c0_170 = arith.constant 0 : index
    %c0_171 = arith.constant 0 : index
    %c0_172 = arith.constant 0 : index
    %218 = vector.load %arg5[%c0_170, %c0_171, %c0_172] : memref<1x16x64xf32, #tpu.memory_space<vmem>>, vector<1x16x32xf32>
    %219 = vector.shape_cast %218 : vector<1x16x32xf32> to vector<16x32xf32>
    %220 = vector.shape_cast %111 : vector<16x32xf32> to vector<1x16x32xf32>
    tpu.vector_store %arg5[%c0_170, %c0_171, %c0_172], %220 {strides = array<i32>} : memref<1x16x64xf32, #tpu.memory_space<vmem>>, vector<1x16x32xf32>,
    %c0_173 = arith.constant 0 : index
    %c0_174 = arith.constant 0 : index
    %c32 = arith.constant 32 : index
    %221 = vector.load %arg5[%c0_173, %c0_174, %c32] : memref<1x16x64xf32, #tpu.memory_space<vmem>>, vector<1x16x32xf32>
    %222 = vector.shape_cast %221 : vector<1x16x32xf32> to vector<16x32xf32>
    %223 = vector.shape_cast %217 : vector<16x32xf32> to vector<1x16x32xf32>
    tpu.vector_store %arg5[%c0_173, %c0_174, %c32], %223 {strides = array<i32>} : memref<1x16x64xf32, #tpu.memory_space<vmem>>, vector<1x16x32xf32>,
    return
  }
  func.func @transform_0(%arg0: i32) -> (i32, i32, i32) {
    %c0_i32 = arith.constant 0 : i32
    %c0_i32_0 = arith.constant 0 : i32
    %c0_i32_1 = arith.constant 0 : i32
    return %arg0, %c0_i32, %c0_i32_0 : i32, i32, i32
  }
  func.func @transform_1(%arg0: i32) -> (i32, i32, i32) {
    %c0_i32 = arith.constant 0 : i32
    %c0_i32_0 = arith.constant 0 : i32
    %c0_i32_1 = arith.constant 0 : i32
    return %arg0, %c0_i32, %c0_i32_0 : i32, i32, i32
  }
  func.func @transform_2(%arg0: i32) -> (i32, i32, i32) {
    %c0_i32 = arith.constant 0 : i32
    %c0_i32_0 = arith.constant 0 : i32
    %c0_i32_1 = arith.constant 0 : i32
    %c0_i32_2 = arith.constant 0 : i32
    return %c0_i32, %c0_i32_0, %c0_i32_1 : i32, i32, i32
  }
  func.func @transform_3(%arg0: i32) -> (i32, i32, i32) {
    %c0_i32 = arith.constant 0 : i32
    %c0_i32_0 = arith.constant 0 : i32
    %c0_i32_1 = arith.constant 0 : i32
    %c0_i32_2 = arith.constant 0 : i32
    return %c0_i32, %c0_i32_0, %c0_i32_1 : i32, i32, i32
  }
  func.func @transform_4(%arg0: i32) -> (i32, i32, i32) {
    %c0_i32 = arith.constant 0 : i32
    %c0_i32_0 = arith.constant 0 : i32
    %c0_i32_1 = arith.constant 0 : i32
    return %arg0, %c0_i32, %c0_i32_0 : i32, i32, i32
  }
}

</mosaic_0001>

<bundles_post_ra>
// kernel: single_signal_down_forward.1
= control target key start
LH: loop header
LB: loop body
LE: loop exit
PB: predicated region body
PF: predicated region fallthrough
CT: control target
= control target key end

     0   :  { %s3898_s15 = smov 0   ;;  %s4471_s0 = inlined_call_operand.vmem [shape: f32[2,16,16], index: 0, kind: input, shape index: {}]   ;;  %s4472_s1 = inlined_call_operand.vmem [shape: f32[2,16,32], index: 1, kind: input, shape index: {}]   ;;  %s4473_s2 = inlined_call_operand.vmem [shape: f32[30,32,32], index: 2, kind: input, shape index: {}]   ;;  %s4474_s3 = inlined_call_operand.vmem [shape: f32[8,1,32], index: 3, kind: input, shape index: {}]   ;;  %s4475_s4 = inlined_call_operand.vmem [shape: f32[2,16,64], index: 4, kind: output, shape index: {}]  }
   0x1 LB: > { %s3136_s16 = sadd.s32 4294967295, %s3869_s15   ;;  %p3140_p0 = scmp.ge.s32.totalorder %s3869_s15, 1  ;;  %s3869_s15 = sphi %s3898_s15, %s14_s15  }
   0x2   : > { %p172_p1 = scmp.lt.s32.totalorder %s3869_s15, 3 }
   0x4   : > { %p173_p2 = pnand %p3140_p0, %p172_p1 }
   0x5   : > { %p203_p3 = scmp.lt.s32.totalorder (!%p173_p2), %s3136_s16, 1  ;;  %s3872_s17 = smov (!%p173_p2), 32  }
   0x6   : > { %176 = sbr.rel (%p173_p2) target bundleno = 1930 (0x78a), region = 36 }
   0xb   : > { %v3150_v0 = vld [vmem:[%s4473_s2 + $0x38] sm:$0xff]  ;;  %v3149_v2 = vld [vmem:[%s4473_s2 + $0x30] sm:$0xff]  ;;  %vm218_vm0 = vcmask 261120   ;;  %v3871_v4 = vmov 0.0   ;;  %vm221_vm1 = vcmask 254976   ;;  %v3148_v5 = vld [vmem:[%s4473_s2 + $0x28] sm:$0xff] }
   0xc   : > { %v236_v1 = vld [vmem:[%s4473_s2 + $0x18] sm:$0xff]  ;;  %3523 = vmatprep.subr.mxu0 %v3150_v0  ;;  %v235_v3 = vld [vmem:[%s4473_s2 + $0x10] sm:$0xff]  ;;  %219 = vst.msk [vmem:[#allocation2] sm:$0xff] %vm218_vm0, %v3871_v4  ;;  %220 = vst.msk [vmem:[#allocation2 + $0x8] sm:$0xff] %vm218_vm0, %v3871_v4  ;;  %s4477_s16 = smov (!%p203_p3, %s3136_s16), 1  ;;  %vm227_vm2 = vcmask 130048  }
   0xd   : > { %3534 = vmatprep.subr.mxu1 %v236_v1  ;;  %3524 = vmatpush3.msra.mxu0 %v3150_v0  ;;  %v234_v6 = vld [vmem:[%s4473_s2 + $0x8] sm:$0xff]  ;;  %222 = vst.msk [vmem:[#allocation2 + $0x10] sm:$0x3] %vm221_vm1, %v3871_v4  ;;  %v3147_v7 = vld [vmem:[%s4473_s2 + $0x20] sm:$0xff]  ;;  %s3932_s7 = sshll.u32 %s4477_s16, 4  ;;  %v3158_v11 = vld [vmem:[%s4473_s2 + $0x58] sm:$0xff] }
   0xe   : > { %3535 = vmatpush3.msra.mxu1 %v236_v1  ;;  %3525 = vmatprep.subr.mxu0 %v3149_v2  ;;  %v233_v8 = vld [vmem:[%s4473_s2] sm:$0xff]  ;;  %s207_s10 = scalar_lea.vmem %s4471_s0, %s3932_s7  ;;  %vm245_vm3 = vcmask 1046528   ;;  %vm414_vm4 = vcmask 1045504   ;;  %v3157_v22 = vld [vmem:[%s4473_s2 + $0x50] sm:$0xff]  ;;  %v3156_v24 = vld [vmem:[%s4473_s2 + $0x48] sm:$0xff]  ;;  %s212_s20 = scalar_lea.vmem %s4472_s1, %s3932_s7  ;;  %vm3066_vm5 = vcmask 523520  }
   0xf   : > { %3536 = vmatprep.subr.mxu1 %v235_v3  ;;  %3526 = vmatpush3.msra.mxu0 %v3149_v2  ;;  %v223_v9 = vld [vmem:[%s207_s10] sm:$0xff]  ;;  %v224_v10 = vld [vmem:[%s207_s10 + $0x8] sm:$0xff]  ;;  %v3165_v28 = vld [vmem:[%s4473_s2 + $0x78] sm:$0xff]  ;;  %s4219_s27 = scalar_lea.vmem %s4475_s4, %s3932_s7 }
  0x10   : > { %3537 = vmatpush3.msra.mxu1 %v235_v3  ;;  %3527 = vmatprep.subr.mxu0 %v3148_v5  ;;  %228 = vst.msk [vmem:[#allocation2 + $0x1] sm:$0xff] %vm227_vm2, %v223_v9  ;;  %229 = vst.msk [vmem:[#allocation2 + $0x9] sm:$0xff] %vm227_vm2, %v224_v10  ;;  %v3155_v26 = vld [vmem:[%s4473_s2 + $0x40] sm:$0xff]  ;;  %v3169_v29 = vld [vmem:[%s4473_s2 + $0x98] sm:$0xff] }
  0x11   : > { %3538 = vmatprep.subr.mxu1 %v234_v6  ;;  %3528 = vmatpush3.msra.mxu0 %v3148_v5  ;;  %v3164_v30 = vld [vmem:[%s4473_s2 + $0x70] sm:$0xff]  ;;  %v3163_v32 = vld [vmem:[%s4473_s2 + $0x68] sm:$0xff]  ;;  %v3162_v34 = vld [vmem:[%s4473_s2 + $0x60] sm:$0xff] }
  0x12   : > { %3539 = vmatpush3.msra.mxu1 %v234_v6  ;;  %3529 = vmatprep.subr.mxu0 %v3147_v7  ;;  %v3168_v31 = vld [vmem:[%s4473_s2 + $0x90] sm:$0xff]  ;;  %v3167_v33 = vld [vmem:[%s4473_s2 + $0x88] sm:$0xff]  ;;  %v3166_v35 = vld [vmem:[%s4473_s2 + $0x80] sm:$0xff] }
  0x13   : > { %3540 = vmatprep.subr.mxu1 %v233_v8  ;;  %3530 = vmatpush3.msra.mxu0 %v3147_v7  ;;  %v3177_v36 = vld [vmem:[%s4473_s2 + $0xb8] sm:$0xff]  ;;  %v3161_v44 = vld [vmem:[%s4474_s3] ss:$0 sm:$0xff]  ;;  %v4011_v54 = vld [vmem:[%s212_s20 + $0x8] sm:$0xff] }
  0x14   : > { %3541 = vmatpush3.msra.mxu1 %v233_v8  ;;  %3545 = vmatprep.subr.mxu0 %v3158_v11  ;;  %v3183_v37 = vld [vmem:[%s4473_s2 + $0xd8] sm:$0xff]  ;;  %v4009_v53 = vld [vmem:[%s212_s20] sm:$0xff]  ;;  %v3182_v63 = vld [vmem:[%s4473_s2 + $0xd0] sm:$0xff] }
  0x15   : > { %3556 = vmatprep.subr.mxu1 %v3169_v29  ;;  %v3176_v2 = vld [vmem:[%s4473_s2 + $0xb0] sm:$0xff]  ;;  %v3181_v3 = vld [vmem:[%s4473_s2 + $0xc8] sm:$0xff]  ;;  %v3180_v6 = vld [vmem:[%s4473_s2 + $0xc0] sm:$0xff] }
  0x16   : > { %v3175_v5 = vld [vmem:[%s4473_s2 + $0xa8] sm:$0xff]  ;;  %v3174_v7 = vld [vmem:[%s4473_s2 + $0xa0] sm:$0xff]  ;;  %v3195_v9 = vld [vmem:[%s4473_s2 + $0x118] sm:$0xff] }
  0x17   : > { %v230_v12 = vld [vmem:[#allocation2] sm:$0xff]  ;;  %v231_v13 = vld [vmem:[#allocation2 + $0x8] sm:$0xff]  ;;  %v232_v14 = vld [vmem:[#allocation2 + $0x10] sm:$0x3] }
  0x18   : > { %v246_v15 = vrot.slane %v230_v12, 1  ;;  %v247_v16 = vrot.slane %v231_v13, 1  ;;  %3542 = vmatprep.mubr.msk.f32.mxu1 %vm218_vm0, %v230_v12  ;;  %v249_v17 = vrot.slane %v232_v14, 1  ;;  %v415_v18 = vrot.slane %v230_v12, 2 }
  0x19   : > { %3543 = vmatmul.mubr.msk.f32.vlgmr.msra.gmra.mxu1 %vm218_vm0, %v231_v13  ;;  %v416_v19 = vrot.slane %v231_v13, 2  ;;  %v418_v25 = vrot.slane %v232_v14, 2  ;;  %v3188_v14 = vld [vmem:[%s4473_s2 + $0xf0] sm:$0xff] }
  0x1a   : > { %v248_v20 = vsel %vm245_vm3, %v246_v15, %v247_v16  ;;  %v250_v21 = vsel %vm245_vm3, %v247_v16, %v249_v17  ;;  %3557 = vmatpush3.msra.mxu1 %v3169_v29  ;;  %v3194_v16 = vld [vmem:[%s4473_s2 + $0x110] sm:$0xff]  ;;  %v3187_v17 = vld [vmem:[%s4473_s2 + $0xe8] sm:$0xff] }
  0x1b   : > { %3531 = vmatprep.mubr.msk.f32.mxu0 %vm218_vm0, %v248_v20  ;;  %v417_v23 = vsel %vm414_vm4, %v415_v18, %v416_v19  ;;  %v419_v27 = vsel %vm414_vm4, %v416_v19, %v418_v25  ;;  %3558 = vmatprep.subr.mxu1 %v3168_v31  ;;  %v3193_v20 = vld [vmem:[%s4473_s2 + $0x108] sm:$0xff] }
  0x1c   : > { %3532 = vmatmul.mubr.msk.f32.vlgmr.msra.gmra.mxu0 %vm218_vm0, %v250_v21  ;;  %3559 = vmatpush3.msra.mxu1 %v3168_v31  ;;  %v3203_v31 = vld [vmem:[%s4473_s2 + $0x138] sm:$0xff] }
  0x1d   : > { %3546 = vmatpush3.msra.mxu0 %v3158_v11  ;;  %3553 = vmatprep.mubr.msk.f32.mxu0 %vm218_vm0, %v417_v23  ;;  %v3189_v11 = vld [vmem:[%s4473_s2 + $0xf8] sm:$0xff] }
  0x1e   : > { %3547 = vmatprep.subr.mxu0 %v3157_v22  ;;  %3560 = vmatprep.subr.mxu1 %v3167_v33 }
  0x1f   : > { %3548 = vmatpush3.msra.mxu0 %v3157_v22  ;;  %3561 = vmatpush3.msra.mxu1 %v3167_v33  ;;  %v3202_v33 = vld [vmem:[%s4473_s2 + $0x130] sm:$0xff] }
  0x20   : > { %3549 = vmatprep.subr.mxu0 %v3156_v24  ;;  %3562 = vmatprep.subr.mxu1 %v3166_v35 }
  0x21   : > { %3550 = vmatpush3.msra.mxu0 %v3156_v24  ;;  %3563 = vmatpush3.msra.mxu1 %v3166_v35  ;;  %v3186_v24 = vld [vmem:[%s4473_s2 + $0xe0] sm:$0xff]  ;;  %v3201_v35 = vld [vmem:[%s4473_s2 + $0x128] sm:$0xff] }
  0x22   : > { %3551 = vmatprep.subr.mxu0 %v3155_v26  ;;  %3578 = vmatprep.subr.mxu1 %v3177_v36 }
  0x23   : > { %3552 = vmatpush3.msra.mxu0 %v3155_v26  ;;  %v3192_v26 = vld [vmem:[%s4473_s2 + $0x100] sm:$0xff] }
  0x24   : > { %3554 = vmatmul.mubr.msk.f32.vlgmr.msra.gmra.mxu0 %vm218_vm0, %v419_v27  ;;  %3567 = vmatprep.subr.mxu0 %v3165_v28 }
  0x25   : > { %3568 = vmatpush3.msra.mxu0 %v3165_v28 }
  0x26   : > { %3569 = vmatprep.subr.mxu0 %v3164_v30 }
  0x27   : > { %3570 = vmatpush3.msra.mxu0 %v3164_v30 }
  0x28   : > { %3571 = vmatprep.subr.mxu0 %v3163_v32 }
  0x29   : > { %3572 = vmatpush3.msra.mxu0 %v3163_v32  ;;  %v3207_v32 = vld [vmem:[%s4473_s2 + $0x158] sm:$0xff] }
  0x2a   : > { %3573 = vmatprep.subr.mxu0 %v3162_v34 }
  0x2b   : > { %3574 = vmatpush3.msra.mxu0 %v3162_v34  ;;  %v3206_v34 = vld [vmem:[%s4473_s2 + $0x150] sm:$0xff] }
  0x2c   : > { %3589 = vmatprep.subr.mxu0 %v3183_v37 }
  0xd9   : > { %v3544_v39 = vpop.f32.mrf.mxu1 }
  0xdb   : > { %v400_v41 = vpop.f32.mrf.mxu1 }
  0xdc   : > { %v3533_v38 = vpop.f32.mrf.mxu0 }
  0xdd   : > { %v406_v42 = vadd.f32 %v3544_v39, %v3533_v38  ;;  %v3204_v38 = vld [vmem:[%s4473_s2 + $0x140] sm:$0xff]  ;;  %v3215_v39 = vld [vmem:[%s4473_s2 + $0x178] sm:$0xff] }
  0xde   : > { %v321_v40 = vpop.f32.mrf.mxu0 }
  0xdf   : > { %v401_v45 = vadd.f32 %v400_v41, %v321_v40 }
  0xe4   : > { %v3555_v43 = vpop.f32.mrf.mxu0 }
  0xe5   : > { %v500_v46 = vadd.f32 %v3555_v43, %v406_v42 }
  0xe6   : > { %v490_v47 = vpop.f32.mrf.mxu0 }
  0xe7   : > { %v3993_v48 = vadd.f32 %v3161_v44, %v500_v46  ;;  %v499_v49 = vadd.f32 %v490_v47, %v401_v45 }
  0xe9   : > { %v511_v50 = vmax.f32 %v3993_v48, 0.0  ;;  %v3996_v51 = vadd.f32 %v3161_v44, %v499_v49 }
  0xeb   : > { %513 = vst.msk [vmem:[#allocation2 + $0x9] sm:$0xff] %vm218_vm0, %v511_v50  ;;  %v510_v52 = vmax.f32 %v3996_v51, 0.0 }
  0xed   : > { %512 = vst.msk [vmem:[#allocation2 + $0x1] sm:$0xff] %vm218_vm0, %v510_v52 }
  0xf2   : > { %v516_v55 = vld [vmem:[#allocation2 + $0x10] sm:$0x3] }
  0xf3   : > { %v533_v58 = vrot.slane %v516_v55, 1  ;;  %v701_v10 = vrot.slane %v516_v55, 2 }
  0xf4   : > { %v514_v56 = vld [vmem:[#allocation2] sm:$0xff]  ;;  %v515_v57 = vld [vmem:[#allocation2 + $0x8] sm:$0xff] }
  0xf5   : > { %784 = vst.msk [vmem:[#allocation2 + $0x1] sm:$0xff] %vm218_vm0, %v4009_v53  ;;  %3575 = vmatprep.mubr.msk.f32.mxu0 %vm218_vm0, %v514_v56  ;;  %v530_v59 = vrot.slane %v514_v56, 1  ;;  %v531_v60 = vrot.slane %v515_v57, 1  ;;  %785 = vst.msk [vmem:[#allocation2 + $0x9] sm:$0xff] %vm218_vm0, %v4011_v54  ;;  %v698_v61 = vrot.slane %v514_v56, 2  ;;  %v699_v62 = vrot.slane %v515_v57, 2 }
  0xf6   : > { %3576 = vmatmul.mubr.msk.f32.vlgmr.msra.gmra.mxu0 %vm218_vm0, %v515_v57 }
  0xf7   : > { %v532_v0 = vsel %vm245_vm3, %v530_v59, %v531_v60  ;;  %v534_v1 = vsel %vm245_vm3, %v531_v60, %v533_v58  ;;  %3590 = vmatpush3.msra.mxu0 %v3183_v37  ;;  %v700_v4 = vsel %vm414_vm4, %v698_v61, %v699_v62  ;;  %v702_v13 = vsel %vm414_vm4, %v699_v62, %v701_v10  ;;  %v3200_v37 = vld [vmem:[%s4473_s2 + $0x120] sm:$0xff] }
  0xf8   : > { %3564 = vmatprep.mubr.msk.f32.mxu1 %vm218_vm0, %v532_v0  ;;  %3591 = vmatprep.subr.mxu0 %v3182_v63 }
  0xf9   : > { %3565 = vmatmul.mubr.msk.f32.vlgmr.msra.gmra.mxu1 %vm218_vm0, %v534_v1  ;;  %3592 = vmatpush3.msra.mxu0 %v3182_v63  ;;  %v3199_v63 = vld [vmem:[%s4474_s3 + $0x1] ss:$0 sm:$0xff] }
  0xfa   : > { %3579 = vmatpush3.msra.mxu1 %v3177_v36  ;;  %3586 = vmatprep.mubr.msk.f32.mxu1 %vm218_vm0, %v700_v4  ;;  %v3205_v36 = vld [vmem:[%s4473_s2 + $0x148] sm:$0xff] }
  0xfb   : > { %3580 = vmatprep.subr.mxu1 %v3176_v2  ;;  %3593 = vmatprep.subr.mxu0 %v3181_v3 }
  0xfc   : > { %3581 = vmatpush3.msra.mxu1 %v3176_v2  ;;  %3594 = vmatpush3.msra.mxu0 %v3181_v3  ;;  %v786_v8 = vld [vmem:[#allocation2] sm:$0xff]  ;;  %v787_v12 = vld [vmem:[#allocation2 + $0x8] sm:$0xff]  ;;  %v788_v15 = vld [vmem:[#allocation2 + $0x10] sm:$0x3] }
  0xfd   : > { %3582 = vmatprep.subr.mxu1 %v3175_v5  ;;  %3595 = vmatprep.subr.mxu0 %v3180_v6  ;;  %v883_v18 = vrot.slane %v786_v8, 1  ;;  %v884_v19 = vrot.slane %v787_v12, 1  ;;  %v974_v21 = vrot.slane %v786_v8, 2  ;;  %v975_v22 = vrot.slane %v787_v12, 2 }
  0xfe   : > { %3583 = vmatpush3.msra.mxu1 %v3175_v5  ;;  %3596 = vmatpush3.msra.mxu0 %v3180_v6  ;;  %v886_v23 = vrot.slane %v788_v15, 1  ;;  %v977_v25 = vrot.slane %v788_v15, 2 }
  0xff   : > { %3584 = vmatprep.subr.mxu1 %v3174_v7  ;;  %3597 = vmatprep.mubr.msk.f32.mxu0 %vm218_vm0, %v786_v8  ;;  %v885_v27 = vsel %vm245_vm3, %v883_v18, %v884_v19  ;;  %v976_v28 = vsel %vm414_vm4, %v974_v21, %v975_v22  ;;  %v3213_v21 = vld [vmem:[%s4473_s2 + $0x168] sm:$0xff] }
 0x100   : > { %3585 = vmatpush3.msra.mxu1 %v3174_v7  ;;  %3611 = vmatprep.subr.mxu0 %v3195_v9  ;;  %v887_v29 = vsel %vm245_vm3, %v884_v19, %v886_v23  ;;  %v978_v30 = vsel %vm414_vm4, %v975_v22, %v977_v25  ;;  %v3214_v19 = vld [vmem:[%s4473_s2 + $0x170] sm:$0xff]  ;;  %v3212_v22 = vld [vmem:[%s4473_s2 + $0x160] sm:$0xff]  ;;  %v3223_v25 = vld [vmem:[%s4473_s2 + $0x198] sm:$0xff] }
 0x101   : > { %3587 = vmatmul.mubr.msk.f32.vlgmr.msra.gmra.mxu1 %vm218_vm0, %v702_v13  ;;  %3600 = vmatprep.subr.mxu1 %v3189_v11 }
 0x102   : > { %3598 = vmatmul.mubr.msk.f32.vlgmr.msra.gmra.mxu0 %vm218_vm0, %v787_v12  ;;  %3601 = vmatpush3.msra.mxu1 %v3189_v11 }
 0x103   : > { %3612 = vmatpush3.msra.mxu0 %v3195_v9  ;;  %3602 = vmatprep.subr.mxu1 %v3188_v14 }
 0x104   : > { %3613 = vmatprep.subr.mxu0 %v3194_v16  ;;  %3603 = vmatpush3.msra.mxu1 %v3188_v14 }
 0x105   : > { %3614 = vmatpush3.msra.mxu0 %v3194_v16  ;;  %3604 = vmatprep.subr.mxu1 %v3187_v17 }
 0x106   : > { %3615 = vmatprep.subr.mxu0 %v3193_v20  ;;  %3605 = vmatpush3.msra.mxu1 %v3187_v17 }
 0x107   : > { %3616 = vmatpush3.msra.mxu0 %v3193_v20  ;;  %3606 = vmatprep.subr.mxu1 %v3186_v24 }
 0x108   : > { %3617 = vmatprep.subr.mxu0 %v3192_v26  ;;  %3607 = vmatpush3.msra.mxu1 %v3186_v24 }
 0x109   : > { %3608 = vmatprep.mubr.msk.f32.mxu1 %vm218_vm0, %v885_v27  ;;  %3618 = vmatpush3.msra.mxu0 %v3192_v26  ;;  %v3227_v26 = vld [vmem:[%s4473_s2 + $0x1b8] sm:$0xff]  ;;  %v3222_v27 = vld [vmem:[%s4473_s2 + $0x190] sm:$0xff] }
 0x10a   : > { %3619 = vmatprep.mubr.msk.f32.mxu0 %vm218_vm0, %v976_v28  ;;  %3609 = vmatmul.mubr.msk.f32.vlgmr.msra.gmra.mxu1 %vm218_vm0, %v887_v29  ;;  %v3226_v28 = vld [vmem:[%s4473_s2 + $0x1b0] sm:$0xff]  ;;  %v3221_v29 = vld [vmem:[%s4473_s2 + $0x188] sm:$0xff] }
 0x10b   : > { %3620 = vmatmul.mubr.msk.f32.vlgmr.msra.gmra.mxu0 %vm218_vm0, %v978_v30  ;;  %3633 = vmatprep.subr.mxu0 %v3203_v31  ;;  %v3225_v30 = vld [vmem:[%s4473_s2 + $0x1a8] sm:$0xff] }
 0x10c   : > { %3622 = vmatprep.subr.mxu1 %v3207_v32  ;;  %3634 = vmatpush3.msra.mxu0 %v3203_v31  ;;  %v3220_v31 = vld [vmem:[%s4473_s2 + $0x180] sm:$0xff] }
 0x10d   : > { %3623 = vmatpush3.msra.mxu1 %v3207_v32  ;;  %3635 = vmatprep.subr.mxu0 %v3202_v33  ;;  %v3224_v32 = vld [vmem:[%s4473_s2 + $0x1a0] sm:$0xff] }
 0x10e   : > { %3624 = vmatprep.subr.mxu1 %v3206_v34  ;;  %3636 = vmatpush3.msra.mxu0 %v3202_v33  ;;  %v3235_v33 = vld [vmem:[%s4473_s2 + $0x1d8] sm:$0xff] }
 0x10f   : > { %3625 = vmatpush3.msra.mxu1 %v3206_v34  ;;  %3637 = vmatprep.subr.mxu0 %v3201_v35 }
 0x110   : > { %3626 = vmatprep.subr.mxu1 %v3205_v36  ;;  %3638 = vmatpush3.msra.mxu0 %v3201_v35 }
 0x111   : > { %3627 = vmatpush3.msra.mxu1 %v3205_v36  ;;  %3639 = vmatprep.subr.mxu0 %v3200_v37 }
 0x112   : > { %3640 = vmatpush3.msra.mxu0 %v3200_v37  ;;  %3628 = vmatprep.subr.mxu1 %v3204_v38 }
 0x113   : > { %3629 = vmatpush3.msra.mxu1 %v3204_v38  ;;  %3655 = vmatprep.subr.mxu0 %v3227_v26 }
 0x114   : > { %3644 = vmatprep.subr.mxu1 %v3215_v39 }
 0x1b6   : > { %v3577_v41 = vpop.f32.mrf.mxu0 }
 0x1b8   : > { %v684_v44 = vpop.f32.mrf.mxu0 }
 0x1b9   : > { %v3566_v40 = vpop.f32.mrf.mxu1 }
 0x1ba   : > { %v690_v45 = vadd.f32 %v3577_v41, %v3566_v40  ;;  %v3219_v40 = vld [vmem:[%s4474_s3 + $0x2] ss:$0 sm:$0xff] }
 0x1bb   : > { %v605_v42 = vpop.f32.mrf.mxu1 }
 0x1bc   : > { %v685_v49 = vadd.f32 %v684_v44, %v605_v42 }
 0x1c1   : > { %v3588_v43 = vpop.f32.mrf.mxu1 }
 0x1c2   : > { %v3599_v46 = vpop.f32.mrf.mxu0  ;;  %v783_v55 = vadd.f32 %v3588_v43, %v690_v45 }
 0x1c3   : > { %v773_v47 = vpop.f32.mrf.mxu1 }
 0x1c4   : > { %v782_v56 = vadd.f32 %v773_v47, %v685_v49  ;;  %v866_v57 = vpop.f32.mrf.mxu0  ;;  %v876_v58 = vadd.f32 %v3599_v46, %v783_v55 }
 0x1c6   : > { %v875_v60 = vadd.f32 %v866_v57, %v782_v56 }
 0x1ca   : > { %v3610_v59 = vpop.f32.mrf.mxu1 }
 0x1cb   : > { %v968_v61 = vadd.f32 %v3610_v59, %v876_v58  ;;  %v3621_v62 = vpop.f32.mrf.mxu0 }
 0x1cc   : > { %v958_v0 = vpop.f32.mrf.mxu1 }
 0x1cd   : > { %v1059_v1 = vadd.f32 %v3621_v62, %v968_v61  ;;  %v967_v2 = vadd.f32 %v958_v0, %v875_v60  ;;  %v1049_v3 = vpop.f32.mrf.mxu0 }
 0x1cf   : > { %v1069_v4 = vadd.f32 %v3199_v63, %v1059_v1  ;;  %v1058_v5 = vadd.f32 %v1049_v3, %v967_v2  ;;  %v3233_v1 = vld [vmem:[%s4473_s2 + $0x1c8] sm:$0xff]  ;;  %v3232_v2 = vld [vmem:[%s4473_s2 + $0x1c0] sm:$0xff] }
 0x1d1   : > { %v1071_v6 = vmax.f32 %v1069_v4, 0.0  ;;  %v1068_v7 = vadd.f32 %v3199_v63, %v1058_v5  ;;  %v3234_v63 = vld [vmem:[%s4473_s2 + $0x1d0] sm:$0xff]  ;;  %v3243_v5 = vld [vmem:[%s4473_s2 + $0x1f8] sm:$0xff] }
 0x1d3   : > { %1073 = vst.msk [vmem:[#allocation2 + $0x9] sm:$0xff] %vm218_vm0, %v1071_v6  ;;  %v1070_v8 = vmax.f32 %v1068_v7, 0.0  ;;  %v3247_v6 = vld [vmem:[%s4473_s2 + $0x218] sm:$0xff]  ;;  %v3242_v7 = vld [vmem:[%s4473_s2 + $0x1f0] sm:$0xff] }
 0x1d5   : > { %1072 = vst.msk [vmem:[#allocation2 + $0x1] sm:$0xff] %vm218_vm0, %v1070_v8  ;;  %v3246_v8 = vld [vmem:[%s4473_s2 + $0x210] sm:$0xff] }
 0x1da   : > { %v1076_v9 = vld [vmem:[#allocation2 + $0x10] sm:$0x3] }
 0x1db   : > { %v1093_v12 = vrot.slane %v1076_v9, 1  ;;  %v1261_v23 = vrot.slane %v1076_v9, 2  ;;  %v3241_v9 = vld [vmem:[%s4473_s2 + $0x1e8] sm:$0xff] }
 0x1dc   : > { %v1074_v10 = vld [vmem:[#allocation2] sm:$0xff]  ;;  %v1075_v11 = vld [vmem:[#allocation2 + $0x8] sm:$0xff] }
 0x1dd   : > { %3641 = vmatprep.mubr.msk.f32.mxu0 %vm218_vm0, %v1074_v10  ;;  %v1090_v13 = vrot.slane %v1074_v10, 1  ;;  %v1091_v14 = vrot.slane %v1075_v11, 1  ;;  %v1258_v15 = vrot.slane %v1074_v10, 2  ;;  %v1259_v16 = vrot.slane %v1075_v11, 2  ;;  %v3245_v10 = vld [vmem:[%s4473_s2 + $0x208] sm:$0xff] }
 0x1de   : > { %3642 = vmatmul.mubr.msk.f32.vlgmr.msra.gmra.mxu0 %vm218_vm0, %v1075_v11  ;;  %v3240_v11 = vld [vmem:[%s4473_s2 + $0x1e0] sm:$0xff] }
 0x1df   : > { %v1092_v17 = vsel %vm245_vm3, %v1090_v13, %v1091_v14  ;;  %v1094_v18 = vsel %vm245_vm3, %v1091_v14, %v1093_v12  ;;  %v1260_v20 = vsel %vm414_vm4, %v1258_v15, %v1259_v16  ;;  %v1262_v24 = vsel %vm414_vm4, %v1259_v16, %v1261_v23  ;;  %3656 = vmatpush3.msra.mxu0 %v3227_v26  ;;  %v3244_v12 = vld [vmem:[%s4473_s2 + $0x200] sm:$0xff]  ;;  %v3255_v13 = vld [vmem:[%s4473_s2 + $0x238] sm:$0xff] }
 0x1e0   : > { %3630 = vmatprep.mubr.msk.f32.mxu1 %vm218_vm0, %v1092_v17  ;;  %3657 = vmatprep.subr.mxu0 %v3226_v28 }
 0x1e1   : > { %3631 = vmatmul.mubr.msk.f32.vlgmr.msra.gmra.mxu1 %vm218_vm0, %v1094_v18  ;;  %3658 = vmatpush3.msra.mxu0 %v3226_v28 }
 0x1e2   : > { %3645 = vmatpush3.msra.mxu1 %v3215_v39  ;;  %3652 = vmatprep.mubr.msk.f32.mxu1 %vm218_vm0, %v1260_v20  ;;  %v3239_v20 = vld [vmem:[%s4474_s3 + $0x3] ss:$0 sm:$0xff] }
 0x1e3   : > { %3646 = vmatprep.subr.mxu1 %v3214_v19  ;;  %3659 = vmatprep.subr.mxu0 %v3225_v30 }
 0x1e4   : > { %3647 = vmatpush3.msra.mxu1 %v3214_v19  ;;  %3660 = vmatpush3.msra.mxu0 %v3225_v30 }
 0x1e5   : > { %3648 = vmatprep.subr.mxu1 %v3213_v21  ;;  %3661 = vmatprep.subr.mxu0 %v3224_v32 }
 0x1e6   : > { %3649 = vmatpush3.msra.mxu1 %v3213_v21  ;;  %3662 = vmatpush3.msra.mxu0 %v3224_v32 }
 0x1e7   : > { %3650 = vmatprep.subr.mxu1 %v3212_v22  ;;  %3677 = vmatprep.subr.mxu0 %v3235_v33 }
 0x1e8   : > { %3651 = vmatpush3.msra.mxu1 %v3212_v22 }
 0x1e9   : > { %3653 = vmatmul.mubr.msk.f32.vlgmr.msra.gmra.mxu1 %vm218_vm0, %v1262_v24  ;;  %3666 = vmatprep.subr.mxu1 %v3223_v25 }
 0x1ea   : > { %3667 = vmatpush3.msra.mxu1 %v3223_v25 }
 0x1eb   : > { %3668 = vmatprep.subr.mxu1 %v3222_v27 }
 0x1ec   : > { %3669 = vmatpush3.msra.mxu1 %v3222_v27 }
 0x1ed   : > { %3670 = vmatprep.subr.mxu1 %v3221_v29 }
 0x1ee   : > { %3671 = vmatpush3.msra.mxu1 %v3221_v29 }
 0x1ef   : > { %3672 = vmatprep.subr.mxu1 %v3220_v31 }
 0x1f0   : > { %3673 = vmatpush3.msra.mxu1 %v3220_v31 }
 0x1f1   : > { %3688 = vmatprep.subr.mxu1 %v3247_v6 }
 0x29e   : > { %v3643_v35 = vpop.f32.mrf.mxu0 }
 0x2a0   : > { %v1244_v38 = vpop.f32.mrf.mxu0 }
 0x2a1   : > { %v3632_v34 = vpop.f32.mrf.mxu1 }
 0x2a2   : > { %v1250_v37 = vadd.f32 %v3643_v35, %v3632_v34 }
 0x2a3   : > { %v1165_v36 = vpop.f32.mrf.mxu1 }
 0x2a4   : > { %v1245_v41 = vadd.f32 %v1244_v38, %v1165_v36 }
 0x2a9   : > { %v3654_v39 = vpop.f32.mrf.mxu1 }
 0x2aa   : > { %v1343_v42 = vadd.f32 %v3654_v39, %v1250_v37  ;;  %v3254_v39 = vld [vmem:[%s4473_s2 + $0x230] sm:$0xff] }
 0x2ab   : > { %v1333_v43 = vpop.f32.mrf.mxu1 }
 0x2ac   : > { %v1353_v44 = vadd.f32 %v3219_v40, %v1343_v42  ;;  %v1342_v45 = vadd.f32 %v1333_v43, %v1245_v41  ;;  %v3253_v41 = vld [vmem:[%s4473_s2 + $0x228] sm:$0xff]  ;;  %v3252_v42 = vld [vmem:[%s4473_s2 + $0x220] sm:$0xff] }
 0x2ae   : > { %v1355_v46 = vadd.f32 %v1353_v44, %v511_v50  ;;  %v1352_v47 = vadd.f32 %v3219_v40, %v1342_v45  ;;  %v3263_v45 = vld [vmem:[%s4473_s2 + $0x258] sm:$0xff] }
 0x2b0   : > { %v1357_v49 = vmax.f32 %v1355_v46, 0.0  ;;  %v1354_v55 = vadd.f32 %v1352_v47, %v510_v52  ;;  %v3267_v46 = vld [vmem:[%s4473_s2 + $0x278] sm:$0xff]  ;;  %v3262_v47 = vld [vmem:[%s4473_s2 + $0x250] sm:$0xff] }
 0x2b2   : > { %1359 = vst.msk [vmem:[#allocation2 + $0x9] sm:$0xff] %vm218_vm0, %v1357_v49  ;;  %v1356_v56 = vmax.f32 %v1354_v55, 0.0  ;;  %v3266_v49 = vld [vmem:[%s4473_s2 + $0x270] sm:$0xff]  ;;  %v3261_v55 = vld [vmem:[%s4473_s2 + $0x248] sm:$0xff] }
 0x2b4   : > { %1358 = vst.msk [vmem:[#allocation2 + $0x1] sm:$0xff] %vm218_vm0, %v1356_v56  ;;  %v3265_v56 = vld [vmem:[%s4473_s2 + $0x268] sm:$0xff] }
 0x2b9   : > { %v1362_v57 = vld [vmem:[#allocation2 + $0x10] sm:$0x3] }
 0x2ba   : > { %v1379_v60 = vrot.slane %v1362_v57, 1  ;;  %v1547_v3 = vrot.slane %v1362_v57, 2  ;;  %v3260_v57 = vld [vmem:[%s4473_s2 + $0x240] sm:$0xff] }
 0x2bb   : > { %v1360_v58 = vld [vmem:[#allocation2] sm:$0xff]  ;;  %v1361_v59 = vld [vmem:[#allocation2 + $0x8] sm:$0xff] }
 0x2bc   : > { %3674 = vmatprep.mubr.msk.f32.mxu1 %vm218_vm0, %v1360_v58  ;;  %v1376_v61 = vrot.slane %v1360_v58, 1  ;;  %v1377_v62 = vrot.slane %v1361_v59, 1  ;;  %v1544_v48 = vrot.slane %v1360_v58, 2  ;;  %v1545_v50 = vrot.slane %v1361_v59, 2  ;;  %v3264_v58 = vld [vmem:[%s4473_s2 + $0x260] sm:$0xff] }
 0x2bd   : > { %3675 = vmatmul.mubr.msk.f32.vlgmr.msra.gmra.mxu1 %vm218_vm0, %v1361_v59  ;;  %v3275_v59 = vld [vmem:[%s4473_s2 + $0x298] sm:$0xff] }
 0x2be   : > { %v1378_v51 = vsel %vm245_vm3, %v1376_v61, %v1377_v62  ;;  %v1380_v52 = vsel %vm245_vm3, %v1377_v62, %v1379_v60  ;;  %v1546_v0 = vsel %vm414_vm4, %v1544_v48, %v1545_v50  ;;  %v1548_v4 = vsel %vm414_vm4, %v1545_v50, %v1547_v3  ;;  %3689 = vmatpush3.msra.mxu1 %v3247_v6  ;;  %v3281_v60 = vld [vmem:[%s4473_s2 + $0x2b8] sm:$0xff] }
 0x2bf   : > { %3663 = vmatprep.mubr.msk.f32.mxu0 %vm218_vm0, %v1378_v51  ;;  %3690 = vmatprep.subr.mxu1 %v3246_v8 }
 0x2c0   : > { %3664 = vmatmul.mubr.msk.f32.vlgmr.msra.gmra.mxu0 %vm218_vm0, %v1380_v52  ;;  %3691 = vmatpush3.msra.mxu1 %v3246_v8 }
 0x2c1   : > { %3678 = vmatpush3.msra.mxu0 %v3235_v33  ;;  %3685 = vmatprep.mubr.msk.f32.mxu0 %vm218_vm0, %v1546_v0 }
 0x2c2   : > { %3679 = vmatprep.subr.mxu0 %v3234_v63  ;;  %3692 = vmatprep.subr.mxu1 %v3245_v10 }
 0x2c3   : > { %3680 = vmatpush3.msra.mxu0 %v3234_v63  ;;  %3693 = vmatpush3.msra.mxu1 %v3245_v10  ;;  %v3259_v63 = vld [vmem:[%s4474_s3 + $0x4] ss:$0 sm:$0xff] }
 0x2c4   : > { %3681 = vmatprep.subr.mxu0 %v3233_v1  ;;  %3694 = vmatprep.subr.mxu1 %v3244_v12 }
 0x2c5   : > { %3682 = vmatpush3.msra.mxu0 %v3233_v1  ;;  %3695 = vmatpush3.msra.mxu1 %v3244_v12 }
 0x2c6   : > { %3683 = vmatprep.subr.mxu0 %v3232_v2  ;;  %3710 = vmatprep.subr.mxu1 %v3255_v13 }
 0x2c7   : > { %3684 = vmatpush3.msra.mxu0 %v3232_v2 }
 0x2c8   : > { %3686 = vmatmul.mubr.msk.f32.vlgmr.msra.gmra.mxu0 %vm218_vm0, %v1548_v4  ;;  %3699 = vmatprep.subr.mxu0 %v3243_v5 }
 0x2c9   : > { %3700 = vmatpush3.msra.mxu0 %v3243_v5 }
 0x2ca   : > { %3701 = vmatprep.subr.mxu0 %v3242_v7 }
 0x2cb   : > { %3702 = vmatpush3.msra.mxu0 %v3242_v7 }
 0x2cc   : > { %3703 = vmatprep.subr.mxu0 %v3241_v9 }
 0x2cd   : > { %3704 = vmatpush3.msra.mxu0 %v3241_v9 }
 0x2ce   : > { %3705 = vmatprep.subr.mxu0 %v3240_v11 }
 0x2cf   : > { %3706 = vmatpush3.msra.mxu0 %v3240_v11 }
 0x2d0   : > { %3721 = vmatprep.subr.mxu0 %v3267_v46 }
 0x37d   : > { %v3676_v15 = vpop.f32.mrf.mxu1 }
 0x37f   : > { %v1530_v18 = vpop.f32.mrf.mxu1 }
 0x380   : > { %v3665_v14 = vpop.f32.mrf.mxu0 }
 0x381   : > { %v1536_v17 = vadd.f32 %v3676_v15, %v3665_v14 }
 0x382   : > { %v1451_v16 = vpop.f32.mrf.mxu0 }
 0x383   : > { %v1531_v21 = vadd.f32 %v1530_v18, %v1451_v16  ;;  %v3280_v16 = vld [vmem:[%s4473_s2 + $0x2b0] sm:$0xff] }
 0x388   : > { %v3687_v19 = vpop.f32.mrf.mxu0 }
 0x389   : > { %v1629_v22 = vadd.f32 %v3687_v19, %v1536_v17 }
 0x38a   : > { %v1619_v23 = vpop.f32.mrf.mxu0 }
 0x38b   : > { %v1639_v24 = vadd.f32 %v3239_v20, %v1629_v22  ;;  %v1628_v25 = vadd.f32 %v1619_v23, %v1531_v21  ;;  %v3278_v21 = vld [vmem:[%s4473_s2 + $0x2a0] sm:$0xff] }
 0x38c   : > { %v3272_v22 = vld [vmem:[%s4473_s2 + $0x280] sm:$0xff] }
 0x38d   : > { %v1641_v26 = vmax.f32 %v1639_v24, 0.0  ;;  %v1638_v27 = vadd.f32 %v3239_v20, %v1628_v25  ;;  %v3273_v20 = vld [vmem:[%s4473_s2 + $0x288] sm:$0xff]  ;;  %v3293_v24 = vld [vmem:[%s4473_s2 + $0x2f8] sm:$0xff] }
 0x38f   : > { %1643 = vst.msk [vmem:[#allocation2 + $0x9] sm:$0xff] %vm218_vm0, %v1641_v26  ;;  %v1640_v28 = vmax.f32 %v1638_v27, 0.0  ;;  %3057 = vst.msk [vmem:[%s4219_s27 + $0x8] sm:$0xff] %vm218_vm0, %v1641_v26  ;;  %v3287_v26 = vld [vmem:[%s4473_s2 + $0x2d8] sm:$0xff] }
 0x391   : > { %1642 = vst.msk [vmem:[#allocation2 + $0x1] sm:$0xff] %vm218_vm0, %v1640_v28  ;;  %3056 = vst.msk [vmem:[%s4219_s27] sm:$0xff] %vm218_vm0, %v1640_v28 }
 0x396   : > { %v1646_v29 = vld [vmem:[#allocation2 + $0x10] sm:$0x3] }
 0x397   : > { %v1663_v32 = vrot.slane %v1646_v29, 1  ;;  %v1831_v43 = vrot.slane %v1646_v29, 2  ;;  %v3286_v29 = vld [vmem:[%s4473_s2 + $0x2d0] sm:$0xff] }
 0x398   : > { %v1644_v30 = vld [vmem:[#allocation2] sm:$0xff]  ;;  %v1645_v31 = vld [vmem:[#allocation2 + $0x8] sm:$0xff] }
 0x399   : > { %3707 = vmatprep.mubr.msk.f32.mxu0 %vm218_vm0, %v1644_v30  ;;  %v1660_v33 = vrot.slane %v1644_v30, 1  ;;  %v1661_v34 = vrot.slane %v1645_v31, 1  ;;  %v1828_v35 = vrot.slane %v1644_v30, 2  ;;  %v1829_v36 = vrot.slane %v1645_v31, 2 }
 0x39a   : > { %3708 = vmatmul.mubr.msk.f32.vlgmr.msra.gmra.mxu0 %vm218_vm0, %v1645_v31  ;;  %v3292_v31 = vld [vmem:[%s4473_s2 + $0x2f0] sm:$0xff] }
 0x39b   : > { %v1662_v37 = vsel %vm245_vm3, %v1660_v33, %v1661_v34  ;;  %v1664_v38 = vsel %vm245_vm3, %v1661_v34, %v1663_v32  ;;  %v1830_v40 = vsel %vm414_vm4, %v1828_v35, %v1829_v36  ;;  %v1832_v44 = vsel %vm414_vm4, %v1829_v36, %v1831_v43  ;;  %3722 = vmatpush3.msra.mxu0 %v3267_v46  ;;  %v3285_v32 = vld [vmem:[%s4473_s2 + $0x2c8] sm:$0xff]  ;;  %v3301_v46 = vld [vmem:[%s4473_s2 + $0x318] sm:$0xff] }
 0x39c   : > { %3696 = vmatprep.mubr.msk.f32.mxu1 %vm218_vm0, %v1662_v37  ;;  %3723 = vmatprep.subr.mxu0 %v3266_v49  ;;  %v3291_v35 = vld [vmem:[%s4473_s2 + $0x2e8] sm:$0xff] }
 0x39d   : > { %3697 = vmatmul.mubr.msk.f32.vlgmr.msra.gmra.mxu1 %vm218_vm0, %v1664_v38  ;;  %3724 = vmatpush3.msra.mxu0 %v3266_v49  ;;  %v3300_v49 = vld [vmem:[%s4473_s2 + $0x310] sm:$0xff] }
 0x39e   : > { %3711 = vmatpush3.msra.mxu1 %v3255_v13  ;;  %3718 = vmatprep.mubr.msk.f32.mxu1 %vm218_vm0, %v1830_v40 }
 0x39f   : > { %3712 = vmatprep.subr.mxu1 %v3254_v39  ;;  %3725 = vmatprep.subr.mxu0 %v3265_v56 }
 0x3a0   : > { %3713 = vmatpush3.msra.mxu1 %v3254_v39  ;;  %3726 = vmatpush3.msra.mxu0 %v3265_v56  ;;  %v3284_v39 = vld [vmem:[%s4473_s2 + $0x2c0] sm:$0xff]  ;;  %v3299_v56 = vld [vmem:[%s4473_s2 + $0x308] sm:$0xff] }
 0x3a1   : > { %3714 = vmatprep.subr.mxu1 %v3253_v41  ;;  %3727 = vmatprep.subr.mxu0 %v3264_v58 }
 0x3a2   : > { %3715 = vmatpush3.msra.mxu1 %v3253_v41  ;;  %3728 = vmatpush3.msra.mxu0 %v3264_v58  ;;  %v3290_v41 = vld [vmem:[%s4473_s2 + $0x2e0] sm:$0xff] }
 0x3a3   : > { %3716 = vmatprep.subr.mxu1 %v3252_v42  ;;  %3743 = vmatprep.subr.mxu0 %v3275_v59  ;;  %v3298_v58 = vld [vmem:[%s4473_s2 + $0x300] sm:$0xff] }
 0x3a4   : > { %3717 = vmatpush3.msra.mxu1 %v3252_v42 }
 0x3a5   : > { %3719 = vmatmul.mubr.msk.f32.vlgmr.msra.gmra.mxu1 %vm218_vm0, %v1832_v44  ;;  %3732 = vmatprep.subr.mxu1 %v3263_v45 }
 0x3a6   : > { %3733 = vmatpush3.msra.mxu1 %v3263_v45 }
 0x3a7   : > { %3734 = vmatprep.subr.mxu1 %v3262_v47 }
 0x3a8   : > { %3735 = vmatpush3.msra.mxu1 %v3262_v47  ;;  %v3305_v47 = vld [vmem:[%s4473_s2 + $0x338] sm:$0xff] }
 0x3a9   : > { %3736 = vmatprep.subr.mxu1 %v3261_v55 }
 0x3aa   : > { %3737 = vmatpush3.msra.mxu1 %v3261_v55  ;;  %v3304_v55 = vld [vmem:[%s4473_s2 + $0x330] sm:$0xff] }
 0x3ab   : > { %3738 = vmatprep.subr.mxu1 %v3260_v57 }
 0x3ac   : > { %3739 = vmatpush3.msra.mxu1 %v3260_v57  ;;  %v3303_v57 = vld [vmem:[%s4473_s2 + $0x328] sm:$0xff] }
 0x3ad   : > { %3754 = vmatprep.subr.mxu1 %v3281_v60 }
 0x45a   : > { %v3709_v62 = vpop.f32.mrf.mxu0 }
 0x45c   : > { %v1814_v51 = vpop.f32.mrf.mxu0 }
 0x45d   : > { %v3698_v61 = vpop.f32.mrf.mxu1 }
 0x45e   : > { %v1820_v50 = vadd.f32 %v3709_v62, %v3698_v61 }
 0x45f   : > { %v1735_v48 = vpop.f32.mrf.mxu1 }
 0x460   : > { %v1815_v0 = vadd.f32 %v1814_v51, %v1735_v48 }
 0x465   : > { %v3720_v52 = vpop.f32.mrf.mxu1 }
 0x466   : > { %v1913_v1 = vadd.f32 %v3720_v52, %v1820_v50 }
 0x467   : > { %v1903_v2 = vpop.f32.mrf.mxu1 }
 0x468   : > { %v4279_v3 = vadd.f32 %v3259_v63, %v1913_v1  ;;  %v1912_v4 = vadd.f32 %v1903_v2, %v1815_v0 }
 0x46a   : > { %v1925_v5 = vmax.f32 %v4279_v3, 0.0  ;;  %v4282_v6 = vadd.f32 %v3259_v63, %v1912_v4 }
 0x46c   : > { %1927 = vst.msk [vmem:[#allocation2 + $0x9] sm:$0xff] %vm218_vm0, %v1925_v5  ;;  %v1924_v7 = vmax.f32 %v4282_v6, 0.0 }
 0x46e   : > { %1926 = vst.msk [vmem:[#allocation2 + $0x1] sm:$0xff] %vm218_vm0, %v1924_v7 }
 0x473   : > { %v1930_v8 = vld [vmem:[#allocation2 + $0x10] sm:$0x3] }
 0x474   : > { %v1947_v11 = vrot.slane %v1930_v8, 1  ;;  %v2115_v25 = vrot.slane %v1930_v8, 2 }
 0x475   : > { %v1928_v9 = vld [vmem:[#allocation2] sm:$0xff]  ;;  %v1929_v10 = vld [vmem:[#allocation2 + $0x8] sm:$0xff] }
 0x476   : > { %3740 = vmatprep.mubr.msk.f32.mxu1 %vm218_vm0, %v1928_v9  ;;  %2198 = vst.msk [vmem:[#allocation2 + $0x1] sm:$0xff] %vm218_vm0, %v4009_v53  ;;  %v1944_v12 = vrot.slane %v1928_v9, 1  ;;  %v1945_v13 = vrot.slane %v1929_v10, 1  ;;  %2199 = vst.msk [vmem:[#allocation2 + $0x9] sm:$0xff] %vm218_vm0, %v4011_v54  ;;  %v2112_v14 = vrot.slane %v1928_v9, 2  ;;  %v2113_v15 = vrot.slane %v1929_v10, 2 }
 0x477   : > { %3741 = vmatmul.mubr.msk.f32.vlgmr.msra.gmra.mxu1 %vm218_vm0, %v1929_v10  ;;  %v3274_v53 = vld [vmem:[%s4473_s2 + $0x290] sm:$0xff]  ;;  %v3279_v54 = vld [vmem:[%s4473_s2 + $0x2a8] sm:$0xff] }
 0x478   : > { %v1946_v17 = vsel %vm245_vm3, %v1944_v12, %v1945_v13  ;;  %v1948_v18 = vsel %vm245_vm3, %v1945_v13, %v1947_v11  ;;  %3755 = vmatpush3.msra.mxu1 %v3281_v60  ;;  %v2114_v19 = vsel %vm414_vm4, %v2112_v14, %v2113_v15  ;;  %v2116_v28 = vsel %vm414_vm4, %v2113_v15, %v2115_v25  ;;  %v3313_v60 = vld [vmem:[%s4473_s2 + $0x358] sm:$0xff]  ;;  %v3297_v14 = vld [vmem:[%s4474_s3 + $0x5] ss:$0 sm:$0xff] }
 0x479   : > { %3729 = vmatprep.mubr.msk.f32.mxu0 %vm218_vm0, %v1946_v17  ;;  %3756 = vmatprep.subr.mxu1 %v3280_v16 }
 0x47a   : > { %3730 = vmatmul.mubr.msk.f32.vlgmr.msra.gmra.mxu0 %vm218_vm0, %v1948_v18  ;;  %3757 = vmatpush3.msra.mxu1 %v3280_v16 }
 0x47b   : > { %3744 = vmatpush3.msra.mxu0 %v3275_v59  ;;  %3751 = vmatprep.mubr.msk.f32.mxu0 %vm218_vm0, %v2114_v19  ;;  %v3302_v59 = vld [vmem:[%s4473_s2 + $0x320] sm:$0xff] }
 0x47c   : > { %3745 = vmatprep.subr.mxu0 %v3274_v53  ;;  %3758 = vmatprep.subr.mxu1 %v3279_v54 }
 0x47d   : > { %3746 = vmatpush3.msra.mxu0 %v3274_v53  ;;  %3759 = vmatpush3.msra.mxu1 %v3279_v54  ;;  %v2200_v23 = vld [vmem:[#allocation2] sm:$0xff]  ;;  %v2201_v27 = vld [vmem:[#allocation2 + $0x8] sm:$0xff]  ;;  %v2202_v30 = vld [vmem:[#allocation2 + $0x10] sm:$0x3] }
 0x47e   : > { %3747 = vmatprep.subr.mxu0 %v3273_v20  ;;  %3760 = vmatprep.subr.mxu1 %v3278_v21  ;;  %v2297_v33 = vrot.slane %v2200_v23, 1  ;;  %v2298_v34 = vrot.slane %v2201_v27, 1  ;;  %v2388_v36 = vrot.slane %v2200_v23, 2  ;;  %v2389_v37 = vrot.slane %v2201_v27, 2 }
 0x47f   : > { %3748 = vmatpush3.msra.mxu0 %v3273_v20  ;;  %3761 = vmatpush3.msra.mxu1 %v3278_v21  ;;  %v2300_v38 = vrot.slane %v2202_v30, 1  ;;  %v2391_v40 = vrot.slane %v2202_v30, 2 }
 0x480   : > { %3749 = vmatprep.subr.mxu0 %v3272_v22  ;;  %3762 = vmatprep.mubr.msk.f32.mxu1 %vm218_vm0, %v2200_v23  ;;  %v2299_v42 = vsel %vm245_vm3, %v2297_v33, %v2298_v34  ;;  %v2390_v43 = vsel %vm414_vm4, %v2388_v36, %v2389_v37 }
 0x481   : > { %3750 = vmatpush3.msra.mxu0 %v3272_v22  ;;  %3776 = vmatprep.subr.mxu1 %v3293_v24  ;;  %v2301_v44 = vsel %vm245_vm3, %v2298_v34, %v2300_v38  ;;  %v2392_v45 = vsel %vm414_vm4, %v2389_v37, %v2391_v40  ;;  %v3311_v34 = vld [vmem:[%s4473_s2 + $0x348] sm:$0xff]  ;;  %v3321_v38 = vld [vmem:[%s4473_s2 + $0x378] sm:$0xff]  ;;  %v3320_v40 = vld [vmem:[%s4473_s2 + $0x370] sm:$0xff] }
 0x482   : > { %3752 = vmatmul.mubr.msk.f32.vlgmr.msra.gmra.mxu0 %vm218_vm0, %v2116_v28  ;;  %3765 = vmatprep.subr.mxu0 %v3287_v26 }
 0x483   : > { %3763 = vmatmul.mubr.msk.f32.vlgmr.msra.gmra.mxu1 %vm218_vm0, %v2201_v27  ;;  %3766 = vmatpush3.msra.mxu0 %v3287_v26 }
 0x484   : > { %3777 = vmatpush3.msra.mxu1 %v3293_v24  ;;  %3767 = vmatprep.subr.mxu0 %v3286_v29 }
 0x485   : > { %3778 = vmatprep.subr.mxu1 %v3292_v31  ;;  %3768 = vmatpush3.msra.mxu0 %v3286_v29 }
 0x486   : > { %3779 = vmatpush3.msra.mxu1 %v3292_v31  ;;  %3769 = vmatprep.subr.mxu0 %v3285_v32 }
 0x487   : > { %3780 = vmatprep.subr.mxu1 %v3291_v35  ;;  %3770 = vmatpush3.msra.mxu0 %v3285_v32  ;;  %v3312_v32 = vld [vmem:[%s4473_s2 + $0x350] sm:$0xff] }
 0x488   : > { %3781 = vmatpush3.msra.mxu1 %v3291_v35  ;;  %3771 = vmatprep.subr.mxu0 %v3284_v39  ;;  %v3310_v35 = vld [vmem:[%s4473_s2 + $0x340] sm:$0xff] }
 0x489   : > { %3782 = vmatprep.subr.mxu1 %v3290_v41  ;;  %3772 = vmatpush3.msra.mxu0 %v3284_v39  ;;  %v3325_v39 = vld [vmem:[%s4473_s2 + $0x398] sm:$0xff] }
 0x48a   : > { %3773 = vmatprep.mubr.msk.f32.mxu0 %vm218_vm0, %v2299_v42  ;;  %3783 = vmatpush3.msra.mxu1 %v3290_v41  ;;  %v3324_v41 = vld [vmem:[%s4473_s2 + $0x390] sm:$0xff]  ;;  %v3319_v42 = vld [vmem:[%s4473_s2 + $0x368] sm:$0xff] }
 0x48b   : > { %3784 = vmatprep.mubr.msk.f32.mxu1 %vm218_vm0, %v2390_v43  ;;  %3774 = vmatmul.mubr.msk.f32.vlgmr.msra.gmra.mxu0 %vm218_vm0, %v2301_v44  ;;  %v3323_v43 = vld [vmem:[%s4473_s2 + $0x388] sm:$0xff]  ;;  %v3318_v44 = vld [vmem:[%s4473_s2 + $0x360] sm:$0xff] }
 0x48c   : > { %3785 = vmatmul.mubr.msk.f32.vlgmr.msra.gmra.mxu1 %vm218_vm0, %v2392_v45  ;;  %3798 = vmatprep.subr.mxu1 %v3301_v46  ;;  %v3322_v45 = vld [vmem:[%s4473_s2 + $0x380] sm:$0xff] }
 0x48d   : > { %3787 = vmatprep.subr.mxu0 %v3305_v47  ;;  %3799 = vmatpush3.msra.mxu1 %v3301_v46  ;;  %v3333_v46 = vld [vmem:[%s4473_s2 + $0x3b8] sm:$0xff] }
 0x48e   : > { %3788 = vmatpush3.msra.mxu0 %v3305_v47  ;;  %3800 = vmatprep.subr.mxu1 %v3300_v49 }
 0x48f   : > { %3789 = vmatprep.subr.mxu0 %v3304_v55  ;;  %3801 = vmatpush3.msra.mxu1 %v3300_v49 }
 0x490   : > { %3790 = vmatpush3.msra.mxu0 %v3304_v55  ;;  %3802 = vmatprep.subr.mxu1 %v3299_v56 }
 0x491   : > { %3791 = vmatprep.subr.mxu0 %v3303_v57  ;;  %3803 = vmatpush3.msra.mxu1 %v3299_v56 }
 0x492   : > { %3792 = vmatpush3.msra.mxu0 %v3303_v57  ;;  %3804 = vmatprep.subr.mxu1 %v3298_v58 }
 0x493   : > { %3805 = vmatpush3.msra.mxu1 %v3298_v58  ;;  %3793 = vmatprep.subr.mxu0 %v3302_v59 }
 0x494   : > { %3794 = vmatpush3.msra.mxu0 %v3302_v59  ;;  %3820 = vmatprep.subr.mxu1 %v3325_v39  ;;  %v3317_v59 = vld [vmem:[%s4474_s3 + $0x6] ss:$0 sm:$0xff] }
 0x495   : > { %3809 = vmatprep.subr.mxu0 %v3313_v60 }
 0x537   : > { %v3742_v62 = vpop.f32.mrf.mxu1 }
 0x539   : > { %v2098_v51 = vpop.f32.mrf.mxu1 }
 0x53a   : > { %v3731_v61 = vpop.f32.mrf.mxu0 }
 0x53b   : > { %v2104_v52 = vadd.f32 %v3742_v62, %v3731_v61 }
 0x53c   : > { %v2019_v48 = vpop.f32.mrf.mxu0 }
 0x53d   : > { %v2099_v1 = vadd.f32 %v2098_v51, %v2019_v48 }
 0x542   : > { %v3753_v50 = vpop.f32.mrf.mxu0 }
 0x543   : > { %v3764_v63 = vpop.f32.mrf.mxu1  ;;  %v2197_v2 = vadd.f32 %v3753_v50, %v2104_v52 }
 0x544   : > { %v2187_v0 = vpop.f32.mrf.mxu0 }
 0x545   : > { %v2196_v4 = vadd.f32 %v2187_v0, %v2099_v1  ;;  %v2280_v8 = vpop.f32.mrf.mxu1  ;;  %v2290_v9 = vadd.f32 %v3764_v63, %v2197_v2 }
 0x547   : > { %v2289_v11 = vadd.f32 %v2280_v8, %v2196_v4 }
 0x54b   : > { %v3775_v10 = vpop.f32.mrf.mxu0 }
 0x54c   : > { %v2382_v12 = vadd.f32 %v3775_v10, %v2290_v9  ;;  %v3786_v13 = vpop.f32.mrf.mxu1 }
 0x54d   : > { %v2372_v15 = vpop.f32.mrf.mxu0 }
 0x54e   : > { %v2473_v16 = vadd.f32 %v3786_v13, %v2382_v12  ;;  %v2381_v17 = vadd.f32 %v2372_v15, %v2289_v11  ;;  %v2463_v18 = vpop.f32.mrf.mxu1  ;;  %v3332_v12 = vld [vmem:[%s4473_s2 + $0x3b0] sm:$0xff]  ;;  %v3330_v15 = vld [vmem:[%s4473_s2 + $0x3a0] sm:$0xff] }
 0x550   : > { %v2483_v53 = vadd.f32 %v3297_v14, %v2473_v16  ;;  %v2472_v54 = vadd.f32 %v2463_v18, %v2381_v17 }
 0x552   : > { %v2485_v19 = vmax.f32 %v2483_v53, 0.0  ;;  %v2482_v20 = vadd.f32 %v3297_v14, %v2472_v54  ;;  %v3331_v14 = vld [vmem:[%s4473_s2 + $0x3a8] sm:$0xff] }
 0x554   : > { %2487 = vst.msk [vmem:[#allocation2 + $0x9] sm:$0xff] %vm218_vm0, %v2485_v19  ;;  %v2484_v21 = vmax.f32 %v2482_v20, 0.0 }
 0x556   : > { %2486 = vst.msk [vmem:[#allocation2 + $0x1] sm:$0xff] %vm218_vm0, %v2484_v21 }
 0x55b   : > { %v2490_v22 = vld [vmem:[#allocation2 + $0x10] sm:$0x3] }
 0x55c   : > { %v2507_v25 = vrot.slane %v2490_v22, 1  ;;  %v2675_v36 = vrot.slane %v2490_v22, 2 }
 0x55d   : > { %v2488_v23 = vld [vmem:[#allocation2] sm:$0xff]  ;;  %v2489_v24 = vld [vmem:[#allocation2 + $0x8] sm:$0xff] }
 0x55e   : > { %v2504_v26 = vrot.slane %v2488_v23, 1  ;;  %3806 = vmatprep.mubr.msk.f32.mxu1 %vm218_vm0, %v2488_v23  ;;  %v2672_v27 = vrot.slane %v2488_v23, 2  ;;  %v2505_v28 = vrot.slane %v2489_v24, 1  ;;  %v2673_v29 = vrot.slane %v2489_v24, 2 }
 0x55f   : > { %3807 = vmatmul.mubr.msk.f32.vlgmr.msra.gmra.mxu1 %vm218_vm0, %v2489_v24 }
 0x560   : > { %v2506_v30 = vsel %vm245_vm3, %v2504_v26, %v2505_v28  ;;  %v2508_v31 = vsel %vm245_vm3, %v2505_v28, %v2507_v25  ;;  %v2674_v33 = vsel %vm414_vm4, %v2672_v27, %v2673_v29  ;;  %v2676_v37 = vsel %vm414_vm4, %v2673_v29, %v2675_v36  ;;  %3821 = vmatpush3.msra.mxu1 %v3325_v39  ;;  %v3337_v26 = vld [vmem:[%s4474_s3 + $0x7] ss:$0 sm:$0xff] }
 0x561   : > { %3795 = vmatprep.mubr.msk.f32.mxu0 %vm218_vm0, %v2506_v30  ;;  %3822 = vmatprep.subr.mxu1 %v3324_v41 }
 0x562   : > { %3796 = vmatmul.mubr.msk.f32.vlgmr.msra.gmra.mxu0 %vm218_vm0, %v2508_v31  ;;  %3823 = vmatpush3.msra.mxu1 %v3324_v41 }
 0x563   : > { %3810 = vmatpush3.msra.mxu0 %v3313_v60  ;;  %3817 = vmatprep.mubr.msk.f32.mxu0 %vm218_vm0, %v2674_v33 }
 0x564   : > { %3811 = vmatprep.subr.mxu0 %v3312_v32  ;;  %3824 = vmatprep.subr.mxu1 %v3323_v43 }
 0x565   : > { %3812 = vmatpush3.msra.mxu0 %v3312_v32  ;;  %3825 = vmatpush3.msra.mxu1 %v3323_v43 }
 0x566   : > { %3813 = vmatprep.subr.mxu0 %v3311_v34  ;;  %3826 = vmatprep.subr.mxu1 %v3322_v45 }
 0x567   : > { %3814 = vmatpush3.msra.mxu0 %v3311_v34  ;;  %3827 = vmatpush3.msra.mxu1 %v3322_v45 }
 0x568   : > { %3815 = vmatprep.subr.mxu0 %v3310_v35  ;;  %3842 = vmatprep.subr.mxu1 %v3333_v46 }
 0x569   : > { %3816 = vmatpush3.msra.mxu0 %v3310_v35 }
 0x56a   : > { %3818 = vmatmul.mubr.msk.f32.vlgmr.msra.gmra.mxu0 %vm218_vm0, %v2676_v37  ;;  %3831 = vmatprep.subr.mxu0 %v3321_v38 }
 0x56b   : > { %3832 = vmatpush3.msra.mxu0 %v3321_v38 }
 0x56c   : > { %3833 = vmatprep.subr.mxu0 %v3320_v40 }
 0x56d   : > { %3834 = vmatpush3.msra.mxu0 %v3320_v40 }
 0x56e   : > { %3835 = vmatprep.subr.mxu0 %v3319_v42 }
 0x56f   : > { %3836 = vmatpush3.msra.mxu0 %v3319_v42 }
 0x570   : > { %3837 = vmatprep.subr.mxu0 %v3318_v44 }
 0x571   : > { %3838 = vmatpush3.msra.mxu0 %v3318_v44 }
 0x61f   : > { %v3808_v49 = vpop.f32.mrf.mxu1 }
 0x621   : > { %v2658_v57 = vpop.f32.mrf.mxu1 }
 0x622   : > { %v3797_v47 = vpop.f32.mrf.mxu0 }
 0x623   : > { %v2664_v56 = vadd.f32 %v3808_v49, %v3797_v47 }
 0x624   : > { %v2579_v55 = vpop.f32.mrf.mxu0 }
 0x625   : > { %v2659_v60 = vadd.f32 %v2658_v57, %v2579_v55 }
 0x62a   : > { %v3819_v58 = vpop.f32.mrf.mxu0 }
 0x62b   : > { %v2757_v61 = vadd.f32 %v3819_v58, %v2664_v56 }
 0x62c   : > { %v2747_v62 = vpop.f32.mrf.mxu0 }
 0x62d   : > { %v2767_v48 = vadd.f32 %v3317_v59, %v2757_v61  ;;  %v2756_v50 = vadd.f32 %v2747_v62, %v2659_v60 }
 0x62f   : > { %v2769_v51 = vadd.f32 %v2767_v48, %v1925_v5  ;;  %v2766_v52 = vadd.f32 %v3317_v59, %v2756_v50 }
 0x631   : > { %v2771_v63 = vmax.f32 %v2769_v51, 0.0  ;;  %v2768_v0 = vadd.f32 %v2766_v52, %v1924_v7 }
 0x633   : > { %2773 = vst.msk [vmem:[#allocation2 + $0x9] sm:$0xff] %vm218_vm0, %v2771_v63  ;;  %v2770_v1 = vmax.f32 %v2768_v0, 0.0 }
 0x635   : > { %2772 = vst.msk [vmem:[#allocation2 + $0x1] sm:$0xff] %vm218_vm0, %v2770_v1 }
 0x63a   : > { %v2776_v2 = vld [vmem:[#allocation2 + $0x10] sm:$0x3] }
 0x63b   : > { %v2793_v9 = vrot.slane %v2776_v2, 1  ;;  %v2961_v16 = vrot.slane %v2776_v2, 2 }
 0x63c   : > { %v2774_v4 = vld [vmem:[#allocation2] sm:$0xff]  ;;  %v2775_v8 = vld [vmem:[#allocation2 + $0x8] sm:$0xff] }
 0x63d   : > { %v2790_v10 = vrot.slane %v2774_v4, 1  ;;  %3839 = vmatprep.mubr.msk.f32.mxu0 %vm218_vm0, %v2774_v4  ;;  %v2958_v11 = vrot.slane %v2774_v4, 2  ;;  %v2791_v3 = vrot.slane %v2775_v8, 1  ;;  %v2959_v5 = vrot.slane %v2775_v8, 2 }
 0x63e   : > { %3840 = vmatmul.mubr.msk.f32.vlgmr.msra.gmra.mxu0 %vm218_vm0, %v2775_v8 }
 0x63f   : > { %v2792_v6 = vsel %vm245_vm3, %v2790_v10, %v2791_v3  ;;  %v2794_v7 = vsel %vm245_vm3, %v2791_v3, %v2793_v9  ;;  %v2960_v13 = vsel %vm414_vm4, %v2958_v11, %v2959_v5  ;;  %v2962_v17 = vsel %vm414_vm4, %v2959_v5, %v2961_v16 }
 0x640   : > { %3828 = vmatprep.mubr.msk.f32.mxu1 %vm218_vm0, %v2792_v6 }
 0x641   : > { %3829 = vmatmul.mubr.msk.f32.vlgmr.msra.gmra.mxu1 %vm218_vm0, %v2794_v7 }
 0x642   : > { %3843 = vmatpush3.msra.mxu1 %v3333_v46  ;;  %3850 = vmatprep.mubr.msk.f32.mxu1 %vm218_vm0, %v2960_v13 }
 0x643   : > { %3844 = vmatprep.subr.mxu1 %v3332_v12 }
 0x644   : > { %3845 = vmatpush3.msra.mxu1 %v3332_v12 }
 0x645   : > { %3846 = vmatprep.subr.mxu1 %v3331_v14 }
 0x646   : > { %3847 = vmatpush3.msra.mxu1 %v3331_v14 }
 0x647   : > { %3848 = vmatprep.subr.mxu1 %v3330_v15 }
 0x648   : > { %3849 = vmatpush3.msra.mxu1 %v3330_v15 }
 0x649   : > { %3851 = vmatmul.mubr.msk.f32.vlgmr.msra.gmra.mxu1 %vm218_vm0, %v2962_v17 }
 0x6fe   : > { %v3841_v53 = vpop.f32.mrf.mxu0 }
 0x700   : > { %v2944_v19 = vpop.f32.mrf.mxu0 }
 0x701   : > { %v3830_v18 = vpop.f32.mrf.mxu1 }
 0x702   : > { %v2950_v21 = vadd.f32 %v3841_v53, %v3830_v18 }
 0x703   : > { %v2865_v54 = vpop.f32.mrf.mxu1 }
 0x704   : > { %v2945_v22 = vadd.f32 %v2944_v19, %v2865_v54 }
 0x709   : > { %v3852_v20 = vpop.f32.mrf.mxu1 }
 0x70a   : > { %v3043_v24 = vadd.f32 %v3852_v20, %v2950_v21 }
 0x70b   : > { %v3033_v23 = vpop.f32.mrf.mxu1 }
 0x70c   : > { %v3042_v25 = vadd.f32 %v3033_v23, %v2945_v22  ;;  %v3053_v28 = vadd.f32 %v3337_v26, %v3043_v24 }
 0x70e   : > { %v3052_v27 = vadd.f32 %v3337_v26, %v3042_v25  ;;  %v3055_v30 = vmax.f32 %v3053_v28, 0.0 }
 0x710   : > { %v3054_v29 = vmax.f32 %v3052_v27, 0.0 }
 0x712   : > { %3060 = vrot.lane.b32.xlu0 %v3054_v29, %s3872_s17 }
 0x716   : > { %3062 = vrot.lane.b32.xlu0 %v3055_v30, %s3872_s17 }
 0x784   : > { %v3061_v31 = vpop.permute.xlu0 %3060 }
 0x785   : > { %3067 = vst.msk [vmem:[%s4219_s27] sm:$0xff] %vm3066_vm5, %v3061_v31 }
 0x788   : > { %v3063_v32 = vpop.permute.xlu0 %3062 }
 0x789   : > { %3068 = vst.msk [vmem:[%s4219_s27 + $0x8] sm:$0xff] %vm3066_vm5, %v3063_v32 }
 0x78a PF: > { %s14_s15 = sadd.s32 1, %s3869_s15  }
 0x78b   : > { %p11_p4 = scmp.ge.s32.totalorder %s14_s15, 4  }
 0x78d   :  { %13 = sbr.rel (!%p11_p4) target bundleno = 1 (0x1), region = 105 }

</bundles_post_ra>
